<compile_context>
chip_gen: v5e
topology: v5e:2x2
jax: 0.10.0
libtpu: 0.0.40
codegen_flags: <defaults>
</compile_context>

<pallas_src>
import jax
import jax.numpy as jnp
from jax import lax
from jax.experimental import pallas as pl
from jax.experimental.pallas import tpu as pltpu


_UNROLL_SEQ_MAX = 32   # statically unroll the time loop up to this many steps


def _make_fused_gru_kernel(L, S, B, H, E):
    """Fused n_layers GRU kernel; one grid step per layer (static L, S, B, H, E)."""
    f32 = jnp.float32
    bf16 = jnp.bfloat16
    H2, H3 = 2 * H, 3 * H

    def kernel(x_ref, wih0_ref, b0_ref, whh_ref, bhn_ref, wihn_ref, bnxt_ref,
               out_ref, hid_ref, gi_scr, y_scr):
        # x_ref    : (S*B, E)    f32   time-major flattened input (row = t*B + b)
        # wih0_ref : (E, 3H)     f32   layer-0 W_ih^T, gates [r|z|n] along lanes
        # b0_ref   : (1, 3H)     f32   layer-0 folded bias [b_ir+b_hr, b_iz+b_hz, b_in]
        # whh_ref  : (1, H, 3H)  bf16  layer-l W_hh^T (streamed per grid step)
        # bhn_ref  : (1, 1, H)   f32   layer-l b_hn (must stay inside r * (...))
        # wihn_ref : (1, H, 3H)  bf16  layer-(l+1) W_ih^T (dummy slot at l == L-1)
        # bnxt_ref : (1, 1, 3H)  f32   layer-(l+1) folded bias
        # out_ref  : (S*B, H)    f32   last-layer outputs (written once, at l == L-1)
        # hid_ref  : (1, B, H)   f32   final hidden of layer l
        # gi_scr   : (S*B, 3H)   f32   current layer's input-side pre-activations
        # y_scr    : (S*B, H)    f32   current layer's outputs (feeds next layer)
        l = pl.program_id(0)
        last = pl.num_programs(0) - 1

        # -- layer-0 prologue: input projection for ALL time steps, one matmul ----
        @pl.when(l == 0)
        def _layer0_input_proj():
            gi_scr[...] = (
                jnp.dot(x_ref[...], wih0_ref[...], preferred_element_type=f32)
                + b0_ref[...])

        w_h3 = whh_ref[0]                              # (H, 3H) bf16, VMEM-resident
        b_hn = jnp.broadcast_to(bhn_ref[0], (B, H))    # hoisted broadcast (f32)

        def step(t, h):
            lo = t * B if isinstance(t, int) else pl.multiple_of(t * B, B)
            gi = gi_scr[pl.ds(lo, B), :]                              # (B, 3H) f32
            # single fused recurrent matmul for all three gates (bf16 -> f32 acc)
            gh = jnp.dot(h.astype(bf16), w_h3, preferred_element_type=f32)
            rz = jax.nn.sigmoid(gi[:, :H2] + gh[:, :H2])              # r|z fused
            r, z = rz[:, :H], rz[:, H:H2]
            n = jnp.tanh(gi[:, H2:] + r * (gh[:, H2:] + b_hn))
            h_new = (1.0 - z) * n + z * h
            y_scr[pl.ds(lo, B), :] = h_new
            return h_new

        h = jnp.zeros((B, H), f32)
        if S <= _UNROLL_SEQ_MAX:
            for t in range(S):       # static unroll: straight-line LLO schedule
                h = step(t, h)
        else:
            h = lax.fori_loop(0, S, step, h)

        hid_ref[0] = h

        # -- last layer: single bulk writeback of the staged outputs --------------
        @pl.when(l == last)
        def _write_outputs():
            out_ref[...] = y_scr[...]

        # -- not last: next layer's input projection, one (S*B,H)@(H,3H) matmul ---
        @pl.when(l < last)
        def _next_layer_input_proj():
            gi_scr[...] = (
                jnp.dot(y_scr[...].astype(bf16), wihn_ref[0],
                        preferred_element_type=f32)
                + bnxt_ref[0])
            # TODO(synk): at production shapes stage y_scr directly in bf16.

    return kernel


def prepare_s_rnn_params(params):
    """One-time preprocessing of raw GRU parameters into the kernel layout.

    Hoisted out of the forward path: per-gate transposes, gate concatenation and
    bias folding happen once, not per call.
    """
    f32, bf16 = jnp.float32, jnp.bfloat16
    L = len(params)
    H = params[0][1].shape[1]

    def fold_bias(b_ih, b_hh):
        # b_hr / b_hz fold into the input-side bias; b_hn must stay inside
        # r * (W_hn h + b_hn) and is passed separately.
        return jnp.concatenate(
            [b_ih[:2 * H] + b_hh[:2 * H], b_ih[2 * H:]]).reshape(1, 3 * H)

    w_ih0, _, b_ih0, b_hh0 = params[0]
    packed = {
        # Layer-0 input projection kept f32 (one-shot, off the critical path).
        "w_ih0_t": jnp.transpose(w_ih0).astype(f32),                    # (E, 3H)
        "b0": fold_bias(b_ih0, b_hh0).astype(f32),                      # (1, 3H)
        # Recurrent weights: gates concatenated along lanes, bf16 MXU operands.
        "w_hh_t": jnp.stack([jnp.transpose(p[1]) for p in params]
                            ).astype(bf16),                             # (L, H, 3H)
        "b_hn": jnp.stack([p[3][2 * H:].reshape(1, H) for p in params]
                          ).astype(f32),                                # (L, 1, H)
    }

    # Slot l holds layer (l+1)'s input-side weights / folded bias; the final slot
    # is a never-read dummy so the stacked operand has a uniform shape.
    w_next, b_next = [], []
    for l in range(1, L):
        w_ih, _, b_ih, b_hh = params[l]
        w_next.append(jnp.transpose(w_ih))
        b_next.append(fold_bias(b_ih, b_hh))
    w_next.append(jnp.zeros((H, 3 * H), f32))
    b_next.append(jnp.zeros((1, 3 * H), f32))
    packed["w_ihn_t"] = jnp.stack(w_next).astype(bf16)                  # (L, H, 3H)
    packed["b_next"] = jnp.stack(b_next).astype(f32)                    # (L, 1, 3H)
    return packed


def s_rnn_forward(x, packed):
    """S_RNN.forward: x (B, S, E) -> (out (B, S, H), hidden (B, n_layers, H))."""
    f32 = jnp.float32
    bf16 = jnp.bfloat16
    B, S, E = x.shape
    L, H, _ = packed["w_hh_t"].shape

    # Time-major, flattened (row index = t*B + b), matching x.permute(1, 0, 2).
    x_flat = jnp.transpose(x, (1, 0, 2)).reshape(S * B, E).astype(f32)

    in_specs = [
        pl.BlockSpec((S * B, E), lambda l: (0, 0)),          # x (fetched once)
        pl.BlockSpec((E, 3 * H), lambda l: (0, 0)),          # W_ih0^T
        pl.BlockSpec((1, 3 * H), lambda l: (0, 0)),          # layer-0 folded bias
        pl.BlockSpec((1, H, 3 * H), lambda l: (l, 0, 0)),    # W_hh^T   (streamed)
        pl.BlockSpec((1, 1, H), lambda l: (l, 0, 0)),        # b_hn     (streamed)
        pl.BlockSpec((1, H, 3 * H), lambda l: (l, 0, 0)),    # next-layer W_ih^T
        pl.BlockSpec((1, 1, 3 * H), lambda l: (l, 0, 0)),    # next-layer folded bias
    ]
    out_specs = [
        pl.BlockSpec((S * B, H), lambda l: (0, 0)),   # out: VMEM-resident, written at l==L-1
        pl.BlockSpec((1, B, H), lambda l: (l, 0, 0)),  # final hidden, one block per layer
    ]
    out_shape = (
        jax.ShapeDtypeStruct((S * B, H), f32),
        jax.ShapeDtypeStruct((L, B, H), f32),
    )
    scratch_shapes = [
        pltpu.VMEM((S * B, 3 * H), f32),   # gi_scr: current layer input projections
        pltpu.VMEM((S * B, H), f32),       # y_scr : current layer outputs
    ]

    # ---- VMEM limit sized from the (double-buffered) block + scratch footprint ---
    def _nbytes(shape, dtype):
        n = 1
        for d in shape:
            n *= int(d)
        return n * jnp.dtype(dtype).itemsize

    block_in = (_nbytes((S * B, E), f32) + _nbytes((E, 3 * H), f32)
                + _nbytes((1, 3 * H), f32)
                + _nbytes((H, 3 * H), bf16) + _nbytes((1, H), f32)
                + _nbytes((H, 3 * H), bf16) + _nbytes((1, 3 * H), f32))
    block_out = _nbytes((S * B, H), f32) + _nbytes((B, H), f32)
    scratch_b = _nbytes((S * B, 3 * H), f32) + _nbytes((S * B, H), f32)
    vmem_limit = int(min(100 << 20,
                         max(16 << 20, 4 * (block_in + block_out) + 2 * scratch_b)))

    # Advisory cost estimate for XLA's scheduler.
    flops = int(2 * S * B * 3 * H * (E + H * (L - 1) + H * L))
    transcendentals = int(3 * H * S * B * L)
    bytes_accessed = int(
        _nbytes((S * B, E), f32) + _nbytes((E, 3 * H), f32)
        + L * (2 * _nbytes((H, 3 * H), bf16)
               + _nbytes((1, H), f32) + _nbytes((1, 3 * H), f32))
        + _nbytes((S * B, H), f32) + _nbytes((L, B, H), f32))

    kernel = _make_fused_gru_kernel(L, S, B, H, E)

    out_flat, hid = pl.pallas_call(
        kernel,
        out_shape=out_shape,
        grid_spec=pltpu.PrefetchScalarGridSpec(
            num_scalar_prefetch=0,
            grid=(L,),                        # one grid step per layer
            in_specs=in_specs,
            out_specs=out_specs,
            scratch_shapes=scratch_shapes,
        ),
        compiler_params=pltpu.CompilerParams(
            dimension_semantics=("arbitrary",),   # layer axis carries state
            vmem_limit_bytes=vmem_limit,
        ),
        cost_estimate=pl.CostEstimate(
            flops=flops,
            transcendentals=transcendentals,
            bytes_accessed=bytes_accessed),
    )(x_flat, packed["w_ih0_t"], packed["b0"], packed["w_hh_t"],
      packed["b_hn"], packed["w_ihn_t"], packed["b_next"])

    out = jnp.transpose(out_flat.reshape(S, B, H), (1, 0, 2))      # (B, S, H)
    hidden = jnp.transpose(hid, (1, 0, 2))                         # (B, L, H)
    return out, hidden


def init_s_rnn_params(key, embed_dim, hidden_dim, n_layers):
    """Deterministic parameter init (PyTorch-style U(-1/sqrt(H), 1/sqrt(H)))."""
    bound = 1.0 / (hidden_dim ** 0.5)
    params = []
    for layer in range(n_layers):
        in_dim = embed_dim if layer == 0 else hidden_dim
        key, k1, k2, k3, k4 = jax.random.split(key, 5)
        w_ih = jax.random.uniform(k1, (3 * hidden_dim, in_dim),
                                  jnp.float32, -bound, bound)
        w_hh = jax.random.uniform(k2, (3 * hidden_dim, hidden_dim),
                                  jnp.float32, -bound, bound)
        b_ih = jax.random.uniform(k3, (3 * hidden_dim,),
                                  jnp.float32, -bound, bound)
        b_hh = jax.random.uniform(k4, (3 * hidden_dim,),
                                  jnp.float32, -bound, bound)
        params.append((w_ih, w_hh, b_ih, b_hh))
    return params


def s_rnn_reference(x, params):
    """Pure-JAX (lax.scan, f32) reference with identical GRU semantics."""
    x_tm = jnp.transpose(x, (1, 0, 2))
    finals = []
    layer_in = x_tm
    for (w_ih, w_hh, b_ih, b_hh) in params:
        H = w_hh.shape[1]
        B = layer_in.shape[1]

        def step(h, x_t, w_ih=w_ih, w_hh=w_hh, b_ih=b_ih, b_hh=b_hh, H=H):
            gi = x_t @ w_ih.T + b_ih
            gh = h @ w_hh.T + b_hh
            r = jax.nn.sigmoid(gi[:, 0:H] + gh[:, 0:H])
            z = jax.nn.sigmoid(gi[:, H:2 * H] + gh[:, H:2 * H])
            n = jnp.tanh(gi[:, 2 * H:3 * H] + r * gh[:, 2 * H:3 * H])
            h_new = (1.0 - z) * n + z * h
            return h_new, h_new

        h0 = jnp.zeros((B, H), jnp.float32)
        h_last, outs = lax.scan(step, h0, layer_in)
        layer_in = outs
        finals.append(h_last)
    out = jnp.transpose(layer_in, (1, 0, 2))
    hidden = jnp.transpose(jnp.stack(finals, axis=0), (1, 0, 2))
    return out, hidden


if __name__ == "__main__":
    # Small shapes consistent with the module.
    batch, seq, embed_dim, hidden_dim, n_layers = 2, 8, 16, 32, 2

    key = jax.random.PRNGKey(0)
    key, kx, kp = jax.random.split(key, 3)
    x = jax.random.normal(kx, (batch, seq, embed_dim), jnp.float32)
    params = init_s_rnn_params(kp, embed_dim, hidden_dim, n_layers)

    packed = prepare_s_rnn_params(params)        # one-time param prep (hoisted)
    fwd = jax.jit(s_rnn_forward)

    out, hidden = fwd(x, packed)
    out = jax.block_until_ready(out)
    hidden = jax.block_until_ready(hidden)

    assert out.shape == (batch, seq, hidden_dim), out.shape
    assert hidden.shape == (batch, n_layers, hidden_dim), hidden.shape

    # Correctness check against a pure-f32 JAX reference.  bf16 MXU operands
    # (f32 accumulation and gate math) give typical max-abs error ~1e-3, so the
    # tolerance is slightly wider than the pure-f32 kernel's 2e-3.
    out_ref, hidden_ref = s_rnn_reference(x, params)
    assert jnp.allclose(out, out_ref, atol=5e-3, rtol=5e-3), \
        float(jnp.max(jnp.abs(out - out_ref)))
    assert jnp.allclose(hidden, hidden_ref, atol=5e-3, rtol=5e-3), \
        float(jnp.max(jnp.abs(hidden - hidden_ref)))

    print("KERNEL_OK")
</pallas_src>

<mosaic_0001>
module attributes {stable_mosaic.version = 11 : i64} {
  func.func @kernel(%arg0: i32, %arg1: memref<16x16xf32, #tpu.memory_space<vmem>>, %arg2: memref<16x96xf32, #tpu.memory_space<vmem>>, %arg3: memref<1x96xf32, #tpu.memory_space<vmem>>, %arg4: memref<1x32x96xbf16, #tpu.memory_space<vmem>>, %arg5: memref<1x1x32xf32, #tpu.memory_space<vmem>>, %arg6: memref<1x32x96xbf16, #tpu.memory_space<vmem>>, %arg7: memref<1x1x96xf32, #tpu.memory_space<vmem>>, %arg8: memref<16x32xf32, #tpu.memory_space<vmem>>, %arg9: memref<1x2x32xf32, #tpu.memory_space<vmem>>, %arg10: memref<16x96xf32, #tpu.memory_space<vmem>>, %arg11: memref<16x32xf32, #tpu.memory_space<vmem>>) attributes {dimension_semantics = [#tpu.dimension_semantics<arbitrary>], iteration_bounds = array<i64: 2>, scalar_prefetch = 0 : i64, scratch_operands = 2 : i64, tpu.core_type = #tpu.core_type<tc>, window_params = [{pipeline_mode = #tpu.pipeline_mode<synchronous>, transform_indices = @transform_0, window_bounds = array<i64: 16, 16>}, {pipeline_mode = #tpu.pipeline_mode<synchronous>, transform_indices = @transform_1, window_bounds = array<i64: 16, 96>}, {pipeline_mode = #tpu.pipeline_mode<synchronous>, transform_indices = @transform_2, window_bounds = array<i64: 1, 96>}, {transform_indices = @transform_3, window_bounds = array<i64: 1, 32, 96>}, {transform_indices = @transform_4, window_bounds = array<i64: 1, 1, 32>}, {transform_indices = @transform_5, window_bounds = array<i64: 1, 32, 96>}, {transform_indices = @transform_6, window_bounds = array<i64: 1, 1, 96>}, {pipeline_mode = #tpu.pipeline_mode<synchronous>, transform_indices = @transform_7, window_bounds = array<i64: 16, 32>}, {transform_indices = @transform_8, window_bounds = array<i64: 1, 2, 32>}]} {
    %c0_i32 = arith.constant 0 : i32
    %0 = arith.cmpi eq, %arg0, %c0_i32 : i32
    %1 = arith.extui %0 : i1 to i32
    %c0_i32_0 = arith.constant 0 : i32
    %2 = arith.cmpi ne, %1, %c0_i32_0 : i32
    scf.if %2 {
      %c0_61 = arith.constant 0 : index
      %c0_62 = arith.constant 0 : index
      %219 = vector.load %arg1[%c0_61, %c0_62] : memref<16x16xf32, #tpu.memory_space<vmem>>, vector<16x16xf32>
      %c0_63 = arith.constant 0 : index
      %c0_64 = arith.constant 0 : index
      %220 = vector.load %arg2[%c0_63, %c0_64] : memref<16x96xf32, #tpu.memory_space<vmem>>, vector<16x96xf32>
      %cst_65 = arith.constant dense<0.000000e+00> : vector<16x96xf32>
      %221 = tpu.matmul %219, %220, %cst_65 {dimension_numbers = #tpu.dot_dimension_numbers<[1], [0], [0], [1], [0, 0, 1, 1], [], []>} : vector<16x16xf32>, vector<16x96xf32>, vector<16x96xf32> -> vector<16x96xf32>
      %c0_66 = arith.constant 0 : index
      %c0_67 = arith.constant 0 : index
      %222 = vector.load %arg3[%c0_66, %c0_67] : memref<1x96xf32, #tpu.memory_space<vmem>>, vector<1x96xf32>
      %223 = vector.broadcast %222 : vector<1x96xf32> to vector<16x96xf32>
      %224 = arith.addf %221, %223 : vector<16x96xf32>
      %c0_68 = arith.constant 0 : index
      %c0_69 = arith.constant 0 : index
      %225 = vector.load %arg10[%c0_68, %c0_69] : memref<16x96xf32, #tpu.memory_space<vmem>>, vector<16x96xf32>
      tpu.vector_store %arg10[%c0_68, %c0_69], %224 {strides = array<i32>} : memref<16x96xf32, #tpu.memory_space<vmem>>, vector<16x96xf32>,
    } else {
    }
    %c0 = arith.constant 0 : index
    %c0_1 = arith.constant 0 : index
    %c0_2 = arith.constant 0 : index
    %3 = vector.load %arg4[%c0, %c0_1, %c0_2] : memref<1x32x96xbf16, #tpu.memory_space<vmem>>, vector<1x32x96xbf16>
    %4 = vector.shape_cast %3 : vector<1x32x96xbf16> to vector<32x96xbf16>
    %c0_3 = arith.constant 0 : index
    %c0_4 = arith.constant 0 : index
    %c0_5 = arith.constant 0 : index
    %5 = vector.load %arg5[%c0_3, %c0_4, %c0_5] : memref<1x1x32xf32, #tpu.memory_space<vmem>>, vector<1x1x32xf32>
    %6 = vector.shape_cast %5 : vector<1x1x32xf32> to vector<1x32xf32>
    %7 = vector.shape_cast %6 : vector<1x32xf32> to vector<1x32xf32>
    %8 = vector.broadcast %7 : vector<1x32xf32> to vector<2x32xf32>
    %cst = arith.constant 0.000000e+00 : f32
    %9 = vector.broadcast %cst : f32 to vector<2x32xf32>
    %c0_6 = arith.constant 0 : index
    %c0_7 = arith.constant 0 : index
    %10 = vector.load %arg10[%c0_6, %c0_7] : memref<16x96xf32, #tpu.memory_space<vmem>>, vector<2x96xf32>
    %11 = arith.truncf %9 : vector<2x32xf32> to vector<2x32xbf16>
    %cst_8 = arith.constant dense<0.000000e+00> : vector<2x96xf32>
    %12 = tpu.matmul %11, %4, %cst_8 {dimension_numbers = #tpu.dot_dimension_numbers<[1], [0], [0], [1], [0, 0, 1, 1], [], []>} : vector<2x32xbf16>, vector<32x96xbf16>, vector<2x96xf32> -> vector<2x96xf32>
    %13 = vector.extract_strided_slice %10 {offsets = [0, 0], sizes = [2, 64], strides = [1, 1]} : vector<2x96xf32> to vector<2x64xf32>
    %14 = vector.extract_strided_slice %12 {offsets = [0, 0], sizes = [2, 64], strides = [1, 1]} : vector<2x96xf32> to vector<2x64xf32>
    %15 = arith.addf %13, %14 : vector<2x64xf32>
    %16 = arith.negf %15 : vector<2x64xf32>
    %17 = math.exp %16 : vector<2x64xf32>
    %cst_9 = arith.constant 1.000000e+00 : f32
    %18 = vector.broadcast %cst_9 : f32 to vector<2x64xf32>
    %19 = arith.addf %18, %17 : vector<2x64xf32>
    %20 = arith.divf %18, %19 : vector<2x64xf32>
    %21 = vector.extract_strided_slice %20 {offsets = [0, 0], sizes = [2, 32], strides = [1, 1]} : vector<2x64xf32> to vector<2x32xf32>
    %22 = vector.extract_strided_slice %20 {offsets = [0, 32], sizes = [2, 32], strides = [1, 1]} : vector<2x64xf32> to vector<2x32xf32>
    %23 = vector.extract_strided_slice %10 {offsets = [0, 64], sizes = [2, 32], strides = [1, 1]} : vector<2x96xf32> to vector<2x32xf32>
    %24 = vector.extract_strided_slice %12 {offsets = [0, 64], sizes = [2, 32], strides = [1, 1]} : vector<2x96xf32> to vector<2x32xf32>
    %25 = arith.addf %24, %8 : vector<2x32xf32>
    %26 = arith.mulf %21, %25 : vector<2x32xf32>
    %27 = arith.addf %23, %26 : vector<2x32xf32>
    %28 = math.tanh %27 : vector<2x32xf32>
    %cst_10 = arith.constant 1.000000e+00 : f32
    %29 = vector.broadcast %cst_10 : f32 to vector<2x32xf32>
    %30 = arith.subf %29, %22 : vector<2x32xf32>
    %31 = arith.mulf %30, %28 : vector<2x32xf32>
    %32 = arith.mulf %22, %9 : vector<2x32xf32>
    %33 = arith.addf %31, %32 : vector<2x32xf32>
    %c0_11 = arith.constant 0 : index
    %c0_12 = arith.constant 0 : index
    %34 = vector.load %arg11[%c0_11, %c0_12] : memref<16x32xf32, #tpu.memory_space<vmem>>, vector<2x32xf32>
    tpu.vector_store %arg11[%c0_11, %c0_12], %33 {strides = array<i32>} : memref<16x32xf32, #tpu.memory_space<vmem>>, vector<2x32xf32>,
    %c2 = arith.constant 2 : index
    %c0_13 = arith.constant 0 : index
    %35 = vector.load %arg10[%c2, %c0_13] : memref<16x96xf32, #tpu.memory_space<vmem>>, vector<2x96xf32>
    %36 = arith.truncf %33 : vector<2x32xf32> to vector<2x32xbf16>
    %cst_14 = arith.constant dense<0.000000e+00> : vector<2x96xf32>
    %37 = tpu.matmul %36, %4, %cst_14 {dimension_numbers = #tpu.dot_dimension_numbers<[1], [0], [0], [1], [0, 0, 1, 1], [], []>} : vector<2x32xbf16>, vector<32x96xbf16>, vector<2x96xf32> -> vector<2x96xf32>
    %38 = vector.extract_strided_slice %35 {offsets = [0, 0], sizes = [2, 64], strides = [1, 1]} : vector<2x96xf32> to vector<2x64xf32>
    %39 = vector.extract_strided_slice %37 {offsets = [0, 0], sizes = [2, 64], strides = [1, 1]} : vector<2x96xf32> to vector<2x64xf32>
    %40 = arith.addf %38, %39 : vector<2x64xf32>
    %41 = arith.negf %40 : vector<2x64xf32>
    %42 = math.exp %41 : vector<2x64xf32>
    %cst_15 = arith.constant 1.000000e+00 : f32
    %43 = vector.broadcast %cst_15 : f32 to vector<2x64xf32>
    %44 = arith.addf %43, %42 : vector<2x64xf32>
    %45 = arith.divf %43, %44 : vector<2x64xf32>
    %46 = vector.extract_strided_slice %45 {offsets = [0, 0], sizes = [2, 32], strides = [1, 1]} : vector<2x64xf32> to vector<2x32xf32>
    %47 = vector.extract_strided_slice %45 {offsets = [0, 32], sizes = [2, 32], strides = [1, 1]} : vector<2x64xf32> to vector<2x32xf32>
    %48 = vector.extract_strided_slice %35 {offsets = [0, 64], sizes = [2, 32], strides = [1, 1]} : vector<2x96xf32> to vector<2x32xf32>
    %49 = vector.extract_strided_slice %37 {offsets = [0, 64], sizes = [2, 32], strides = [1, 1]} : vector<2x96xf32> to vector<2x32xf32>
    %50 = arith.addf %49, %8 : vector<2x32xf32>
    %51 = arith.mulf %46, %50 : vector<2x32xf32>
    %52 = arith.addf %48, %51 : vector<2x32xf32>
    %53 = math.tanh %52 : vector<2x32xf32>
    %cst_16 = arith.constant 1.000000e+00 : f32
    %54 = vector.broadcast %cst_16 : f32 to vector<2x32xf32>
    %55 = arith.subf %54, %47 : vector<2x32xf32>
    %56 = arith.mulf %55, %53 : vector<2x32xf32>
    %57 = arith.mulf %47, %33 : vector<2x32xf32>
    %58 = arith.addf %56, %57 : vector<2x32xf32>
    %c2_17 = arith.constant 2 : index
    %c0_18 = arith.constant 0 : index
    %59 = vector.load %arg11[%c2_17, %c0_18] : memref<16x32xf32, #tpu.memory_space<vmem>>, vector<2x32xf32>
    tpu.vector_store %arg11[%c2_17, %c0_18], %58 {strides = array<i32>} : memref<16x32xf32, #tpu.memory_space<vmem>>, vector<2x32xf32>,
    %c4 = arith.constant 4 : index
    %c0_19 = arith.constant 0 : index
    %60 = vector.load %arg10[%c4, %c0_19] : memref<16x96xf32, #tpu.memory_space<vmem>>, vector<2x96xf32>
    %61 = arith.truncf %58 : vector<2x32xf32> to vector<2x32xbf16>
    %cst_20 = arith.constant dense<0.000000e+00> : vector<2x96xf32>
    %62 = tpu.matmul %61, %4, %cst_20 {dimension_numbers = #tpu.dot_dimension_numbers<[1], [0], [0], [1], [0, 0, 1, 1], [], []>} : vector<2x32xbf16>, vector<32x96xbf16>, vector<2x96xf32> -> vector<2x96xf32>
    %63 = vector.extract_strided_slice %60 {offsets = [0, 0], sizes = [2, 64], strides = [1, 1]} : vector<2x96xf32> to vector<2x64xf32>
    %64 = vector.extract_strided_slice %62 {offsets = [0, 0], sizes = [2, 64], strides = [1, 1]} : vector<2x96xf32> to vector<2x64xf32>
    %65 = arith.addf %63, %64 : vector<2x64xf32>
    %66 = arith.negf %65 : vector<2x64xf32>
    %67 = math.exp %66 : vector<2x64xf32>
    %cst_21 = arith.constant 1.000000e+00 : f32
    %68 = vector.broadcast %cst_21 : f32 to vector<2x64xf32>
    %69 = arith.addf %68, %67 : vector<2x64xf32>
    %70 = arith.divf %68, %69 : vector<2x64xf32>
    %71 = vector.extract_strided_slice %70 {offsets = [0, 0], sizes = [2, 32], strides = [1, 1]} : vector<2x64xf32> to vector<2x32xf32>
    %72 = vector.extract_strided_slice %70 {offsets = [0, 32], sizes = [2, 32], strides = [1, 1]} : vector<2x64xf32> to vector<2x32xf32>
    %73 = vector.extract_strided_slice %60 {offsets = [0, 64], sizes = [2, 32], strides = [1, 1]} : vector<2x96xf32> to vector<2x32xf32>
    %74 = vector.extract_strided_slice %62 {offsets = [0, 64], sizes = [2, 32], strides = [1, 1]} : vector<2x96xf32> to vector<2x32xf32>
    %75 = arith.addf %74, %8 : vector<2x32xf32>
    %76 = arith.mulf %71, %75 : vector<2x32xf32>
    %77 = arith.addf %73, %76 : vector<2x32xf32>
    %78 = math.tanh %77 : vector<2x32xf32>
    %cst_22 = arith.constant 1.000000e+00 : f32
    %79 = vector.broadcast %cst_22 : f32 to vector<2x32xf32>
    %80 = arith.subf %79, %72 : vector<2x32xf32>
    %81 = arith.mulf %80, %78 : vector<2x32xf32>
    %82 = arith.mulf %72, %58 : vector<2x32xf32>
    %83 = arith.addf %81, %82 : vector<2x32xf32>
    %c4_23 = arith.constant 4 : index
    %c0_24 = arith.constant 0 : index
    %84 = vector.load %arg11[%c4_23, %c0_24] : memref<16x32xf32, #tpu.memory_space<vmem>>, vector<2x32xf32>
    tpu.vector_store %arg11[%c4_23, %c0_24], %83 {strides = array<i32>} : memref<16x32xf32, #tpu.memory_space<vmem>>, vector<2x32xf32>,
    %c6 = arith.constant 6 : index
    %c0_25 = arith.constant 0 : index
    %85 = vector.load %arg10[%c6, %c0_25] : memref<16x96xf32, #tpu.memory_space<vmem>>, vector<2x96xf32>
    %86 = arith.truncf %83 : vector<2x32xf32> to vector<2x32xbf16>
    %cst_26 = arith.constant dense<0.000000e+00> : vector<2x96xf32>
    %87 = tpu.matmul %86, %4, %cst_26 {dimension_numbers = #tpu.dot_dimension_numbers<[1], [0], [0], [1], [0, 0, 1, 1], [], []>} : vector<2x32xbf16>, vector<32x96xbf16>, vector<2x96xf32> -> vector<2x96xf32>
    %88 = vector.extract_strided_slice %85 {offsets = [0, 0], sizes = [2, 64], strides = [1, 1]} : vector<2x96xf32> to vector<2x64xf32>
    %89 = vector.extract_strided_slice %87 {offsets = [0, 0], sizes = [2, 64], strides = [1, 1]} : vector<2x96xf32> to vector<2x64xf32>
    %90 = arith.addf %88, %89 : vector<2x64xf32>
    %91 = arith.negf %90 : vector<2x64xf32>
    %92 = math.exp %91 : vector<2x64xf32>
    %cst_27 = arith.constant 1.000000e+00 : f32
    %93 = vector.broadcast %cst_27 : f32 to vector<2x64xf32>
    %94 = arith.addf %93, %92 : vector<2x64xf32>
    %95 = arith.divf %93, %94 : vector<2x64xf32>
    %96 = vector.extract_strided_slice %95 {offsets = [0, 0], sizes = [2, 32], strides = [1, 1]} : vector<2x64xf32> to vector<2x32xf32>
    %97 = vector.extract_strided_slice %95 {offsets = [0, 32], sizes = [2, 32], strides = [1, 1]} : vector<2x64xf32> to vector<2x32xf32>
    %98 = vector.extract_strided_slice %85 {offsets = [0, 64], sizes = [2, 32], strides = [1, 1]} : vector<2x96xf32> to vector<2x32xf32>
    %99 = vector.extract_strided_slice %87 {offsets = [0, 64], sizes = [2, 32], strides = [1, 1]} : vector<2x96xf32> to vector<2x32xf32>
    %100 = arith.addf %99, %8 : vector<2x32xf32>
    %101 = arith.mulf %96, %100 : vector<2x32xf32>
    %102 = arith.addf %98, %101 : vector<2x32xf32>
    %103 = math.tanh %102 : vector<2x32xf32>
    %cst_28 = arith.constant 1.000000e+00 : f32
    %104 = vector.broadcast %cst_28 : f32 to vector<2x32xf32>
    %105 = arith.subf %104, %97 : vector<2x32xf32>
    %106 = arith.mulf %105, %103 : vector<2x32xf32>
    %107 = arith.mulf %97, %83 : vector<2x32xf32>
    %108 = arith.addf %106, %107 : vector<2x32xf32>
    %c6_29 = arith.constant 6 : index
    %c0_30 = arith.constant 0 : index
    %109 = vector.load %arg11[%c6_29, %c0_30] : memref<16x32xf32, #tpu.memory_space<vmem>>, vector<2x32xf32>
    tpu.vector_store %arg11[%c6_29, %c0_30], %108 {strides = array<i32>} : memref<16x32xf32, #tpu.memory_space<vmem>>, vector<2x32xf32>,
    %c8 = arith.constant 8 : index
    %c0_31 = arith.constant 0 : index
    %110 = vector.load %arg10[%c8, %c0_31] : memref<16x96xf32, #tpu.memory_space<vmem>>, vector<2x96xf32>
    %111 = arith.truncf %108 : vector<2x32xf32> to vector<2x32xbf16>
    %cst_32 = arith.constant dense<0.000000e+00> : vector<2x96xf32>
    %112 = tpu.matmul %111, %4, %cst_32 {dimension_numbers = #tpu.dot_dimension_numbers<[1], [0], [0], [1], [0, 0, 1, 1], [], []>} : vector<2x32xbf16>, vector<32x96xbf16>, vector<2x96xf32> -> vector<2x96xf32>
    %113 = vector.extract_strided_slice %110 {offsets = [0, 0], sizes = [2, 64], strides = [1, 1]} : vector<2x96xf32> to vector<2x64xf32>
    %114 = vector.extract_strided_slice %112 {offsets = [0, 0], sizes = [2, 64], strides = [1, 1]} : vector<2x96xf32> to vector<2x64xf32>
    %115 = arith.addf %113, %114 : vector<2x64xf32>
    %116 = arith.negf %115 : vector<2x64xf32>
    %117 = math.exp %116 : vector<2x64xf32>
    %cst_33 = arith.constant 1.000000e+00 : f32
    %118 = vector.broadcast %cst_33 : f32 to vector<2x64xf32>
    %119 = arith.addf %118, %117 : vector<2x64xf32>
    %120 = arith.divf %118, %119 : vector<2x64xf32>
    %121 = vector.extract_strided_slice %120 {offsets = [0, 0], sizes = [2, 32], strides = [1, 1]} : vector<2x64xf32> to vector<2x32xf32>
    %122 = vector.extract_strided_slice %120 {offsets = [0, 32], sizes = [2, 32], strides = [1, 1]} : vector<2x64xf32> to vector<2x32xf32>
    %123 = vector.extract_strided_slice %110 {offsets = [0, 64], sizes = [2, 32], strides = [1, 1]} : vector<2x96xf32> to vector<2x32xf32>
    %124 = vector.extract_strided_slice %112 {offsets = [0, 64], sizes = [2, 32], strides = [1, 1]} : vector<2x96xf32> to vector<2x32xf32>
    %125 = arith.addf %124, %8 : vector<2x32xf32>
    %126 = arith.mulf %121, %125 : vector<2x32xf32>
    %127 = arith.addf %123, %126 : vector<2x32xf32>
    %128 = math.tanh %127 : vector<2x32xf32>
    %cst_34 = arith.constant 1.000000e+00 : f32
    %129 = vector.broadcast %cst_34 : f32 to vector<2x32xf32>
    %130 = arith.subf %129, %122 : vector<2x32xf32>
    %131 = arith.mulf %130, %128 : vector<2x32xf32>
    %132 = arith.mulf %122, %108 : vector<2x32xf32>
    %133 = arith.addf %131, %132 : vector<2x32xf32>
    %c8_35 = arith.constant 8 : index
    %c0_36 = arith.constant 0 : index
    %134 = vector.load %arg11[%c8_35, %c0_36] : memref<16x32xf32, #tpu.memory_space<vmem>>, vector<2x32xf32>
    tpu.vector_store %arg11[%c8_35, %c0_36], %133 {strides = array<i32>} : memref<16x32xf32, #tpu.memory_space<vmem>>, vector<2x32xf32>,
    %c10 = arith.constant 10 : index
    %c0_37 = arith.constant 0 : index
    %135 = vector.load %arg10[%c10, %c0_37] : memref<16x96xf32, #tpu.memory_space<vmem>>, vector<2x96xf32>
    %136 = arith.truncf %133 : vector<2x32xf32> to vector<2x32xbf16>
    %cst_38 = arith.constant dense<0.000000e+00> : vector<2x96xf32>
    %137 = tpu.matmul %136, %4, %cst_38 {dimension_numbers = #tpu.dot_dimension_numbers<[1], [0], [0], [1], [0, 0, 1, 1], [], []>} : vector<2x32xbf16>, vector<32x96xbf16>, vector<2x96xf32> -> vector<2x96xf32>
    %138 = vector.extract_strided_slice %135 {offsets = [0, 0], sizes = [2, 64], strides = [1, 1]} : vector<2x96xf32> to vector<2x64xf32>
    %139 = vector.extract_strided_slice %137 {offsets = [0, 0], sizes = [2, 64], strides = [1, 1]} : vector<2x96xf32> to vector<2x64xf32>
    %140 = arith.addf %138, %139 : vector<2x64xf32>
    %141 = arith.negf %140 : vector<2x64xf32>
    %142 = math.exp %141 : vector<2x64xf32>
    %cst_39 = arith.constant 1.000000e+00 : f32
    %143 = vector.broadcast %cst_39 : f32 to vector<2x64xf32>
    %144 = arith.addf %143, %142 : vector<2x64xf32>
    %145 = arith.divf %143, %144 : vector<2x64xf32>
    %146 = vector.extract_strided_slice %145 {offsets = [0, 0], sizes = [2, 32], strides = [1, 1]} : vector<2x64xf32> to vector<2x32xf32>
    %147 = vector.extract_strided_slice %145 {offsets = [0, 32], sizes = [2, 32], strides = [1, 1]} : vector<2x64xf32> to vector<2x32xf32>
    %148 = vector.extract_strided_slice %135 {offsets = [0, 64], sizes = [2, 32], strides = [1, 1]} : vector<2x96xf32> to vector<2x32xf32>
    %149 = vector.extract_strided_slice %137 {offsets = [0, 64], sizes = [2, 32], strides = [1, 1]} : vector<2x96xf32> to vector<2x32xf32>
    %150 = arith.addf %149, %8 : vector<2x32xf32>
    %151 = arith.mulf %146, %150 : vector<2x32xf32>
    %152 = arith.addf %148, %151 : vector<2x32xf32>
    %153 = math.tanh %152 : vector<2x32xf32>
    %cst_40 = arith.constant 1.000000e+00 : f32
    %154 = vector.broadcast %cst_40 : f32 to vector<2x32xf32>
    %155 = arith.subf %154, %147 : vector<2x32xf32>
    %156 = arith.mulf %155, %153 : vector<2x32xf32>
    %157 = arith.mulf %147, %133 : vector<2x32xf32>
    %158 = arith.addf %156, %157 : vector<2x32xf32>
    %c10_41 = arith.constant 10 : index
    %c0_42 = arith.constant 0 : index
    %159 = vector.load %arg11[%c10_41, %c0_42] : memref<16x32xf32, #tpu.memory_space<vmem>>, vector<2x32xf32>
    tpu.vector_store %arg11[%c10_41, %c0_42], %158 {strides = array<i32>} : memref<16x32xf32, #tpu.memory_space<vmem>>, vector<2x32xf32>,
    %c12 = arith.constant 12 : index
    %c0_43 = arith.constant 0 : index
    %160 = vector.load %arg10[%c12, %c0_43] : memref<16x96xf32, #tpu.memory_space<vmem>>, vector<2x96xf32>
    %161 = arith.truncf %158 : vector<2x32xf32> to vector<2x32xbf16>
    %cst_44 = arith.constant dense<0.000000e+00> : vector<2x96xf32>
    %162 = tpu.matmul %161, %4, %cst_44 {dimension_numbers = #tpu.dot_dimension_numbers<[1], [0], [0], [1], [0, 0, 1, 1], [], []>} : vector<2x32xbf16>, vector<32x96xbf16>, vector<2x96xf32> -> vector<2x96xf32>
    %163 = vector.extract_strided_slice %160 {offsets = [0, 0], sizes = [2, 64], strides = [1, 1]} : vector<2x96xf32> to vector<2x64xf32>
    %164 = vector.extract_strided_slice %162 {offsets = [0, 0], sizes = [2, 64], strides = [1, 1]} : vector<2x96xf32> to vector<2x64xf32>
    %165 = arith.addf %163, %164 : vector<2x64xf32>
    %166 = arith.negf %165 : vector<2x64xf32>
    %167 = math.exp %166 : vector<2x64xf32>
    %cst_45 = arith.constant 1.000000e+00 : f32
    %168 = vector.broadcast %cst_45 : f32 to vector<2x64xf32>
    %169 = arith.addf %168, %167 : vector<2x64xf32>
    %170 = arith.divf %168, %169 : vector<2x64xf32>
    %171 = vector.extract_strided_slice %170 {offsets = [0, 0], sizes = [2, 32], strides = [1, 1]} : vector<2x64xf32> to vector<2x32xf32>
    %172 = vector.extract_strided_slice %170 {offsets = [0, 32], sizes = [2, 32], strides = [1, 1]} : vector<2x64xf32> to vector<2x32xf32>
    %173 = vector.extract_strided_slice %160 {offsets = [0, 64], sizes = [2, 32], strides = [1, 1]} : vector<2x96xf32> to vector<2x32xf32>
    %174 = vector.extract_strided_slice %162 {offsets = [0, 64], sizes = [2, 32], strides = [1, 1]} : vector<2x96xf32> to vector<2x32xf32>
    %175 = arith.addf %174, %8 : vector<2x32xf32>
    %176 = arith.mulf %171, %175 : vector<2x32xf32>
    %177 = arith.addf %173, %176 : vector<2x32xf32>
    %178 = math.tanh %177 : vector<2x32xf32>
    %cst_46 = arith.constant 1.000000e+00 : f32
    %179 = vector.broadcast %cst_46 : f32 to vector<2x32xf32>
    %180 = arith.subf %179, %172 : vector<2x32xf32>
    %181 = arith.mulf %180, %178 : vector<2x32xf32>
    %182 = arith.mulf %172, %158 : vector<2x32xf32>
    %183 = arith.addf %181, %182 : vector<2x32xf32>
    %c12_47 = arith.constant 12 : index
    %c0_48 = arith.constant 0 : index
    %184 = vector.load %arg11[%c12_47, %c0_48] : memref<16x32xf32, #tpu.memory_space<vmem>>, vector<2x32xf32>
    tpu.vector_store %arg11[%c12_47, %c0_48], %183 {strides = array<i32>} : memref<16x32xf32, #tpu.memory_space<vmem>>, vector<2x32xf32>,
    %c14 = arith.constant 14 : index
    %c0_49 = arith.constant 0 : index
    %185 = vector.load %arg10[%c14, %c0_49] : memref<16x96xf32, #tpu.memory_space<vmem>>, vector<2x96xf32>
    %186 = arith.truncf %183 : vector<2x32xf32> to vector<2x32xbf16>
    %cst_50 = arith.constant dense<0.000000e+00> : vector<2x96xf32>
    %187 = tpu.matmul %186, %4, %cst_50 {dimension_numbers = #tpu.dot_dimension_numbers<[1], [0], [0], [1], [0, 0, 1, 1], [], []>} : vector<2x32xbf16>, vector<32x96xbf16>, vector<2x96xf32> -> vector<2x96xf32>
    %188 = vector.extract_strided_slice %185 {offsets = [0, 0], sizes = [2, 64], strides = [1, 1]} : vector<2x96xf32> to vector<2x64xf32>
    %189 = vector.extract_strided_slice %187 {offsets = [0, 0], sizes = [2, 64], strides = [1, 1]} : vector<2x96xf32> to vector<2x64xf32>
    %190 = arith.addf %188, %189 : vector<2x64xf32>
    %191 = arith.negf %190 : vector<2x64xf32>
    %192 = math.exp %191 : vector<2x64xf32>
    %cst_51 = arith.constant 1.000000e+00 : f32
    %193 = vector.broadcast %cst_51 : f32 to vector<2x64xf32>
    %194 = arith.addf %193, %192 : vector<2x64xf32>
    %195 = arith.divf %193, %194 : vector<2x64xf32>
    %196 = vector.extract_strided_slice %195 {offsets = [0, 0], sizes = [2, 32], strides = [1, 1]} : vector<2x64xf32> to vector<2x32xf32>
    %197 = vector.extract_strided_slice %195 {offsets = [0, 32], sizes = [2, 32], strides = [1, 1]} : vector<2x64xf32> to vector<2x32xf32>
    %198 = vector.extract_strided_slice %185 {offsets = [0, 64], sizes = [2, 32], strides = [1, 1]} : vector<2x96xf32> to vector<2x32xf32>
    %199 = vector.extract_strided_slice %187 {offsets = [0, 64], sizes = [2, 32], strides = [1, 1]} : vector<2x96xf32> to vector<2x32xf32>
    %200 = arith.addf %199, %8 : vector<2x32xf32>
    %201 = arith.mulf %196, %200 : vector<2x32xf32>
    %202 = arith.addf %198, %201 : vector<2x32xf32>
    %203 = math.tanh %202 : vector<2x32xf32>
    %cst_52 = arith.constant 1.000000e+00 : f32
    %204 = vector.broadcast %cst_52 : f32 to vector<2x32xf32>
    %205 = arith.subf %204, %197 : vector<2x32xf32>
    %206 = arith.mulf %205, %203 : vector<2x32xf32>
    %207 = arith.mulf %197, %183 : vector<2x32xf32>
    %208 = arith.addf %206, %207 : vector<2x32xf32>
    %c14_53 = arith.constant 14 : index
    %c0_54 = arith.constant 0 : index
    %209 = vector.load %arg11[%c14_53, %c0_54] : memref<16x32xf32, #tpu.memory_space<vmem>>, vector<2x32xf32>
    tpu.vector_store %arg11[%c14_53, %c0_54], %208 {strides = array<i32>} : memref<16x32xf32, #tpu.memory_space<vmem>>, vector<2x32xf32>,
    %c0_55 = arith.constant 0 : index
    %c0_56 = arith.constant 0 : index
    %c0_57 = arith.constant 0 : index
    %210 = vector.load %arg9[%c0_55, %c0_56, %c0_57] : memref<1x2x32xf32, #tpu.memory_space<vmem>>, vector<1x2x32xf32>
    %211 = vector.shape_cast %210 : vector<1x2x32xf32> to vector<2x32xf32>
    %212 = vector.shape_cast %208 : vector<2x32xf32> to vector<1x2x32xf32>
    tpu.vector_store %arg9[%c0_55, %c0_56, %c0_57], %212 {strides = array<i32>} : memref<1x2x32xf32, #tpu.memory_space<vmem>>, vector<1x2x32xf32>,
    %c1_i32 = arith.constant 1 : i32
    %213 = arith.cmpi eq, %arg0, %c1_i32 : i32
    %214 = arith.extui %213 : i1 to i32
    %c0_i32_58 = arith.constant 0 : i32
    %215 = arith.cmpi ne, %214, %c0_i32_58 : i32
    scf.if %215 {
      %c0_61 = arith.constant 0 : index
      %c0_62 = arith.constant 0 : index
      %219 = vector.load %arg11[%c0_61, %c0_62] : memref<16x32xf32, #tpu.memory_space<vmem>>, vector<16x32xf32>
      %c0_63 = arith.constant 0 : index
      %c0_64 = arith.constant 0 : index
      %220 = vector.load %arg8[%c0_63, %c0_64] : memref<16x32xf32, #tpu.memory_space<vmem>>, vector<16x32xf32>
      tpu.vector_store %arg8[%c0_63, %c0_64], %219 {strides = array<i32>} : memref<16x32xf32, #tpu.memory_space<vmem>>, vector<16x32xf32>,
    } else {
    }
    %c1_i32_59 = arith.constant 1 : i32
    %216 = arith.cmpi slt, %arg0, %c1_i32_59 : i32
    %217 = arith.extui %216 : i1 to i32
    %c0_i32_60 = arith.constant 0 : i32
    %218 = arith.cmpi ne, %217, %c0_i32_60 : i32
    scf.if %218 {
      %c0_61 = arith.constant 0 : index
      %c0_62 = arith.constant 0 : index
      %219 = vector.load %arg11[%c0_61, %c0_62] : memref<16x32xf32, #tpu.memory_space<vmem>>, vector<16x32xf32>
      %220 = arith.truncf %219 : vector<16x32xf32> to vector<16x32xbf16>
      %c0_63 = arith.constant 0 : index
      %c0_64 = arith.constant 0 : index
      %c0_65 = arith.constant 0 : index
      %221 = vector.load %arg6[%c0_63, %c0_64, %c0_65] : memref<1x32x96xbf16, #tpu.memory_space<vmem>>, vector<1x32x96xbf16>
      %222 = vector.shape_cast %221 : vector<1x32x96xbf16> to vector<32x96xbf16>
      %cst_66 = arith.constant dense<0.000000e+00> : vector<16x96xf32>
      %223 = tpu.matmul %220, %222, %cst_66 {dimension_numbers = #tpu.dot_dimension_numbers<[1], [0], [0], [1], [0, 0, 1, 1], [], []>} : vector<16x32xbf16>, vector<32x96xbf16>, vector<16x96xf32> -> vector<16x96xf32>
      %c0_67 = arith.constant 0 : index
      %c0_68 = arith.constant 0 : index
      %c0_69 = arith.constant 0 : index
      %224 = vector.load %arg7[%c0_67, %c0_68, %c0_69] : memref<1x1x96xf32, #tpu.memory_space<vmem>>, vector<1x1x96xf32>
      %225 = vector.shape_cast %224 : vector<1x1x96xf32> to vector<1x96xf32>
      %226 = vector.broadcast %225 : vector<1x96xf32> to vector<16x96xf32>
      %227 = arith.addf %223, %226 : vector<16x96xf32>
      %c0_70 = arith.constant 0 : index
      %c0_71 = arith.constant 0 : index
      %228 = vector.load %arg10[%c0_70, %c0_71] : memref<16x96xf32, #tpu.memory_space<vmem>>, vector<16x96xf32>
      tpu.vector_store %arg10[%c0_70, %c0_71], %227 {strides = array<i32>} : memref<16x96xf32, #tpu.memory_space<vmem>>, vector<16x96xf32>,
    } else {
    }
    return
  }
  func.func @transform_0(%arg0: i32) -> (i32, i32) {
    %c0_i32 = arith.constant 0 : i32
    %c0_i32_0 = arith.constant 0 : i32
    %c0_i32_1 = arith.constant 0 : i32
    return %c0_i32, %c0_i32_0 : i32, i32
  }
  func.func @transform_1(%arg0: i32) -> (i32, i32) {
    %c0_i32 = arith.constant 0 : i32
    %c0_i32_0 = arith.constant 0 : i32
    %c0_i32_1 = arith.constant 0 : i32
    return %c0_i32, %c0_i32_0 : i32, i32
  }
  func.func @transform_2(%arg0: i32) -> (i32, i32) {
    %c0_i32 = arith.constant 0 : i32
    %c0_i32_0 = arith.constant 0 : i32
    %c0_i32_1 = arith.constant 0 : i32
    return %c0_i32, %c0_i32_0 : i32, i32
  }
  func.func @transform_3(%arg0: i32) -> (i32, i32, i32) {
    %c0_i32 = arith.constant 0 : i32
    %c0_i32_0 = arith.constant 0 : i32
    %c0_i32_1 = arith.constant 0 : i32
    return %arg0, %c0_i32, %c0_i32_0 : i32, i32, i32
  }
  func.func @transform_4(%arg0: i32) -> (i32, i32, i32) {
    %c0_i32 = arith.constant 0 : i32
    %c0_i32_0 = arith.constant 0 : i32
    %c0_i32_1 = arith.constant 0 : i32
    return %arg0, %c0_i32, %c0_i32_0 : i32, i32, i32
  }
  func.func @transform_5(%arg0: i32) -> (i32, i32, i32) {
    %c0_i32 = arith.constant 0 : i32
    %c0_i32_0 = arith.constant 0 : i32
    %c0_i32_1 = arith.constant 0 : i32
    return %arg0, %c0_i32, %c0_i32_0 : i32, i32, i32
  }
  func.func @transform_6(%arg0: i32) -> (i32, i32, i32) {
    %c0_i32 = arith.constant 0 : i32
    %c0_i32_0 = arith.constant 0 : i32
    %c0_i32_1 = arith.constant 0 : i32
    return %arg0, %c0_i32, %c0_i32_0 : i32, i32, i32
  }
  func.func @transform_7(%arg0: i32) -> (i32, i32) {
    %c0_i32 = arith.constant 0 : i32
    %c0_i32_0 = arith.constant 0 : i32
    %c0_i32_1 = arith.constant 0 : i32
    return %c0_i32, %c0_i32_0 : i32, i32
  }
  func.func @transform_8(%arg0: i32) -> (i32, i32, i32) {
    %c0_i32 = arith.constant 0 : i32
    %c0_i32_0 = arith.constant 0 : i32
    %c0_i32_1 = arith.constant 0 : i32
    return %arg0, %c0_i32, %c0_i32_0 : i32, i32, i32
  }
}

</mosaic_0001>

<bundles_post_ra>
// kernel: s_rnn_forward.1
= control target key start
LH: loop header
LB: loop body
LE: loop exit
PB: predicated region body
PF: predicated region fallthrough
CT: control target
= control target key end

     0   :  { %s1731_s0 = inlined_call_operand.vmem [shape: f32[16,16], index: 0, kind: input, shape index: {}]   ;;  %s1732_s1 = inlined_call_operand.hbm [shape: f32[16,96], index: 1, kind: input, shape index: {}]   ;;  %s1733_s2 = inlined_call_operand.vmem [shape: f32[1,96], index: 2, kind: input, shape index: {}]   ;;  %s1734_s3 = inlined_call_operand.vmem [shape: bf16[2,32,96], index: 3, kind: input, shape index: {}]   ;;  %s1735_s4 = inlined_call_operand.vmem [shape: f32[2,1,32], index: 4, kind: input, shape index: {}]   ;;  %s1736_s5 = inlined_call_operand.hbm [shape: bf16[2,32,96], index: 5, kind: input, shape index: {}]   ;;  %s1737_s6 = inlined_call_operand.vmem [shape: f32[2,1,96], index: 6, kind: input, shape index: {}]   ;;  %s1738_s7 = inlined_call_operand.vmem [shape: f32[16,32], index: 7, kind: output, shape index: {0}]   ;;  %s1739_s8 = inlined_call_operand.vmem [shape: f32[2,2,32], index: 8, kind: output, shape index: {1}]  }
   0x1   :  { %1740 = sst [smem:[#allocation10_spill]] %s1732_s1 }
   0x2   :  { %14 = vsyncpa [#allocation5], 0 }
   0x3   :  { %15 = vsyncpa [#allocation7], 0 }
   0x4   :  { %17 = vsyncpa [#allocation7 + $0x1], 0  ;;  %s1473_s27 = smov 0   ;;  %s1475_s28 = smov 0  }
   0x5   :  { %s1477_s29 = smov 0   ;;  %s1479_s30 = smov 0  }
   0x6 LB: > { %s1492_s9 = sadd.s32 4294967295, %s1418_s30   ;;  %p158_p0 = scmp.ne.s32.totalorder %s1410_s28, %s1406_s27  ;;  %s1418_s30 = sphi %s1479_s30, %s1748_s30   ;;  %s1414_s29 = sphi %s1477_s29, %s1747_s29   ;;  %s1410_s28 = sphi %s1475_s28, %s1746_s28   ;;  %s1406_s27 = sphi %s1473_s27, %s1745_s27  }
   0x7   : > { %p159_p1 = scmp.eq.s32.totalorder %s1492_s9, 0  ;;  %p1153_p2 = scmp.ge.s32.totalorder %s1418_s30, 1 }
   0x8   : > { %p242_p3 = scmp.lt.s32.totalorder %s1418_s30, 3  ;;  %p1154_p4 = scmp.ne.s32.totalorder %s1492_s9, 0 }
   0x9   : > { %p1501_p5 = por %p159_p1, %p158_p0  ;;  %s1742_s1 = sld [smem:[#allocation10_spill]] }
   0xa   : > { %p1508_p6 = pnand %p1153_p2, %p242_p3  ;;  %s1420_s15 = smov [#allocation4]  }
   0xb   : > { %s258_s16 = sshll.u32 %s1420_s15, 4  ;;  %s1517_s17 = sadd.s32 1, %s1418_s30   ;;  %s259_s16 = int_to_ptr.vmem [resolvable:$true] %s258_s16 }
   0xc   : > { %p1218_p7 = pneg %p1508_p6  ;;  %s1421_s18 = smov 128  }
   0xd   : > { %s1422_s19 = smov 8   ;;  %s142_s20 = ssub.s32 %s1418_s30, %s1517_s17 }
   0xe   : > { %p1219_p8 = pnand %p1218_p7, %p159_p1  ;;  %s145_s21 = sadd.s32 1, %s1414_s29 }
   0xf   : > { %s256_s13 = sshll.u32 %s1742_s1, 4  ;;  %p143_p9 = scmp.eq.s32.totalorder %s142_s20, 0  ;;  %s257_s13 = int_to_ptr.hbm [resolvable:$true] %s256_s13 }
  0x10   : > { %1221 = dma.hbm_to_vmem [thread:$0]  (!%p1219_p8), %s257_s13, 256, %s259_s16, [#allocation5], %s1421_s18, %s1421_s18, %s1422_s19  }
  0x11   : > { %p152_p10 = scmp.ne.s32.totalorder %s1414_s29, %s1410_s28  ;;  %p153_p11 = scmp.eq.s32.totalorder %s1418_s30, 0 }
  0x12   : > { %p1227_p12 = scmp.lt.s32.totalorder %s1418_s30, 2  ;;  %s289_s23 = sand.u32 1, %s1414_s29  }
  0x13   : > { %s1527_s22 = scalar_select %p143_p9, %s1414_s29, %s145_s21  }
  0x14   : > { %p154_p13 = por %p153_p11, %p152_p10  ;;  %s1156_s24 = sshll.u32 %s289_s23, 4 }
  0x15   : > { %s1204_s25 = sshll.u32 %s1418_s30, 4  ;;  %s293_s12 = scalar_lea.vmem [#allocation6], %s1156_s24 }
  0x16   : > { %s298_s11 = scalar_lea.hbm %s1736_s5, %s1204_s25  ;;  %s301_s15 = sshll.u32 %s293_s12, 4  ;;  %s302_s15 = int_to_ptr.vmem [resolvable:$true] %s301_s15 }
  0x17   : > { %s299_s1 = sshll.u32 %s298_s11, 4  ;;  %p1534_p0 = pnand %p1227_p12, %p154_p13  ;;  %s300_s1 = int_to_ptr.hbm [resolvable:$true] %s299_s1 }
  0x18   : > { %s290_s16 = scalar_lea.sflag [#allocation7], %s289_s23  ;;  %s1350_s18 = sshra.s32 %s300_s1, 4  ;;  %s1351_s18 = int_to_ptr.hbm [resolvable:$true] %s1350_s18 }
  0x19   : > { %s1352_s19 = scalar_lea.hbm %s1351_s18, 16  ;;  %p1354_p3 = pneg %p1534_p0 }
  0x1a   : > { %p1353_p2 = scmp.ne.s32.totalorder %s1351_s18, %s1352_s19  ;;  %s1357_s21 = scalar_lea.hbm %s1736_s5, 32 }
  0x1b   : > { %p1358_p9 = scmp.lt.s32.totalorder %s1351_s18, %s1736_s5  ;;  %p1359_p10 = scmp.lt.s32.totalorder %s1357_s21, %s1352_s19 }
  0x1c   : > { %p1355_p7 = pnand %p1354_p3, %p1353_p2 }
  0x1d   : > { %p1360_p11 = por %p1359_p10, %p1358_p9 }
  0x1e   : > { %p1356_p8 = pneg %p1355_p7 }
  0x20   : > { %p1361_p12 = pnand %p1360_p11, %p1356_p8 }
  0x22   : > { %1364 = shalt.err (!%p1361_p12)
}
  0x23   : > { %s1423_s23 = smov 64   ;;  %s1424_s26 = smov 4  }
  0x24   : > { %1225 = dma.hbm_to_vmem [thread:$0]  (!%p1534_p0), %s300_s1, 256, %s302_s15, %s290_s16, %s1423_s23, %s1423_s23, %s1424_s26  }
  0x25   : > { %319 = sbr.rel (%p1508_p6) target bundleno = 4980 (0x1374), region = 48 }
  0x2a   : > { %1397 = dma.done.wait (%p159_p1), [#allocation5], 256  }
  0x2b   : > { %1399 = vsyncadd (%p159_p1), [#allocation5], 4294967040  ;;  %s326_s27 = sand.u32 1, %s1410_s28  }
  0x2c   : > { %s1555_s11 = sshll.u32 %s326_s27, 4  ;;  %s327_s12 = scalar_lea.sflag [#allocation7], %s326_s27 }
  0x2d   : > { %s330_s18 = scalar_lea.vmem [#allocation6], %s1555_s11 }
  0x2e   : > { %1401 = dma.done.wait (%p1501_p5), %s327_s12, 256  }
  0x2f   : > { %1403 = vsyncadd (%p1501_p5), %s327_s12, 4294967040  ;;  %p374_p6 = scmp.lt.s32.totalorder %s1492_s9, 1 }
  0x31   : > { %s1564_s1 = scalar_select %p374_p6, %s1492_s9, 1 }
  0x32   : > { %393 = sbr.rel (%p1154_p4) target bundleno = 189 (0xbd), region = 60 }
  0x33   : > { %s1205_s14 = sshll.u32 %s1564_s1, 4  ;;  %s381_s16 = scalar_lea.vmem %s1735_s4, %s1564_s1 }
  0x34   : > { %s378_s20 = scalar_lea.vmem %s1734_s3, %s1205_s14  ;;  %s384_s24 = scalar_lea.vmem %s1737_s6, %s1564_s1 }
  0x35   : > { %s1164_s25 = sshll.u32 %s1564_s1, 1 }
  0x36   : > { %s1582_s27 = scalar_lea.vmem %s1739_s8, %s1164_s25 }
  0x37   : > { %v397_v0 = vld [vmem:[#allocation4 + $0x8] sm:$0xff]  ;;  %v396_v1 = vld [vmem:[#allocation4] sm:$0xff]  ;;  %vm402_vm0 = vcmask 130048   ;;  %vm432_vm1 = vcmask 785408  }
  0x38   : > { %423 = vmatpush.msra.mxu0 %v397_v0  ;;  %1210 = vmatpush.msra.mxu1 %v397_v0  ;;  %v394_v2 = vld [vmem:[%s1731_s0] sm:$0xff]  ;;  %v395_v3 = vld [vmem:[%s1731_s0 + $0x8] sm:$0xff] }
  0x39   : > { %v1269_v4 = vld [vmem:[%s1733_s2] ss:$0 sm:$0xff] }
  0x3a   : > { %424 = vmatpush.msra.mxu0 %v396_v1  ;;  %1211 = vmatpush.msra.mxu1 %v396_v1 }
  0x3b   : > { %1166 = vmatmul.msk.f32.vlgmr.msra.gmra.mxu0 %vm402_vm0, %v394_v2  ;;  %1167 = vmatmul.msk.f32.vlgmr.msra.gmra.mxu1 %vm402_vm0, %v395_v3 }
  0xb8   : > { %v426_v5 = vpop.f32.mrf.mxu0  ;;  %v429_v6 = vpop.f32.mrf.mxu1 }
  0xb9   : > { %v427_v7 = vadd.f32 %v1269_v4, %v426_v5  ;;  %v430_v8 = vadd.f32 %v1269_v4, %v429_v6 }
  0xbb   : > { %433 = vst.msk [vmem:[#allocation2] sm:$0xff] %vm432_vm1, %v427_v7 }
  0xbc   : > { %434 = vst.msk [vmem:[#allocation2 + $0x8] sm:$0xff] %vm432_vm1, %v430_v8 }
  0xbd PF: > { %v1207_v9 = vld [vmem:[%s378_s20 + $0x8] sm:$0xff]  ;;  %v1270_v10 = vld [vmem:[%s381_s16] ss:$0 sm:$0xff]  ;;  %s1425_s10 = smov 64   ;;  %v1426_v12 = vmov 0   ;;  %s1427_s16 = smov 96  }
  0xbe   : > { %465 = vmatpush.bf16.msra.mxu0 %v1207_v9  ;;  %v1206_v11 = vld [vmem:[%s378_s20] sm:$0xff]  ;;  %535 = vmatpush.bf16.msra.mxu1 %v1207_v9  ;;  %vm455_vm6 = vcmask 261120   ;;  %p1191_p1 = scmp.ne.s32.totalorder %s1492_s9, 1 }
  0xbf   : > { %492 = vrot.lane.b32.xlu0 %v1270_v10, %s1425_s10  ;;  %601 = vmatpush.bf16.msra.mxu2 %v1207_v9 }
  0xc0   : > { %667 = vmatpush.bf16.msra.mxu3 %v1207_v9 }
  0xc2   : > { %466 = vmatpush.bf16.msra.mxu0 %v1206_v11  ;;  %536 = vmatpush.bf16.msra.mxu1 %v1206_v11  ;;  %v442_v17 = vld [vmem:[#allocation2] sm:$0x3]  ;;  %v521_v47 = vld [vmem:[#allocation2 + $0x2] sm:$0x3] }
  0xc3   : > { %602 = vmatpush.bf16.msra.mxu2 %v1206_v11 }
  0xc4   : > { %668 = vmatpush.bf16.msra.mxu3 %v1206_v11 }
  0xc5   : > { %467 = vmatmul.bf16.vlgmr.msra.gmra.mxu0 %v1426_v12 }
  0xc6   : > { %733 = vmatpush.bf16.msrb.mxu0 %v1207_v9  ;;  %799 = vmatpush.bf16.msrb.mxu1 %v1207_v9 }
  0xc7   : > { %865 = vmatpush.bf16.msrb.mxu2 %v1207_v9 }
  0xc8   : > { %931 = vmatpush.bf16.msrb.mxu3 %v1207_v9 }
  0xca   : > { %734 = vmatpush.bf16.msrb.mxu0 %v1206_v11  ;;  %800 = vmatpush.bf16.msrb.mxu1 %v1206_v11 }
  0xcb   : > { %866 = vmatpush.bf16.msrb.mxu2 %v1206_v11 }
  0xcc   : > { %932 = vmatpush.bf16.msrb.mxu3 %v1206_v11 }
 0x131   : > { %v1596_v13 = vpop.permute.xlu0 %492 }
 0x142   : > { %v468_v14 = vpop.f32.mrf.mxu0 }
 0x143   : > { %v495_v15 = vadd.f32 %v1596_v13, %v468_v14  ;;  %v472_v18 = vadd.f32 %v468_v14, %v442_v17  ;;  %v587_v14 = vld [vmem:[#allocation2 + $0x4] sm:$0x3] }
 0x145   : > { %497 = vrot.lane.b32.xlu0 %v495_v15, %s1425_s10  ;;  %v1176_v19 = vmul.f32 -1.442695, %v472_v18 }
 0x147   : > { %1271 = vpow2.f32 %v1176_v19 }
 0x14a   : > { %v470_v16 = vpop.f32.mrf.mxu0 }
 0x14d   : > { %v1272_v20 = vpop.eup %1271 }
 0x14e   : > { %v476_v21 = vadd.f32 1.0, %v1272_v20 }
 0x150   : > { %1273 = vrcp.f32 %v476_v21  ;;  %v488_v27 = vand.u32 2147483648, %v476_v21  ;;  %vm482_vm3 = vweird.f32 %v476_v21  ;;  %v486_v28 = vand.u32 2147483647, %v476_v21 }
 0x152   : > { %v489_v30 = vor.u32 1.1754944e-38, %v488_v27  ;;  %vm487_vm5 = vcmp.eq.f32.partialorder %v486_v28, 8.507059e+37 }
 0x156   : > { %v1274_v22 = vpop.eup %1273 }
 0x157   : > { %v478_v23 = vmul.f32 %v1274_v22, %v476_v21  ;;  %vm483_vm2 = vweird.f32 %v1274_v22 }
 0x158   : > { %vm484_vm4 = vmor %vm482_vm3, %vm483_vm2 }
 0x159   : > { %v479_v24 = vsub.f32 1.0, %v478_v23 }
 0x15b   : > { %v480_v25 = vmul.f32 %v1274_v22, %v479_v24 }
 0x15d   : > { %v481_v26 = vadd.f32 %v1274_v22, %v480_v25 }
 0x15f   : > { %v485_v29 = vsel %vm484_vm4, %v1274_v22, %v481_v26 }
 0x160   : > { %v490_v32 = vsel %vm487_vm5, %v489_v30, %v485_v29 }
 0x161   : > { %v507_v37 = vsub.f32 1.0, %v490_v32  ;;  %v513_v39 = vmul.f32 0.0, %v490_v32 }
 0x1b7   : > { %v498_v31 = vpop.permute.xlu0 %497 }
 0x1b8   : > { %v500_v33 = vmul.f32 %v498_v31, %v490_v32 }
 0x1ba   : > { %502 = vrot.lane.b32.xlu1 %v500_v33, %s1425_s10 }
 0x22c   : > { %v503_v34 = vpop.permute.xlu1 %502 }
 0x22d   : > { %v505_v35 = vadd.f32 %v503_v34, %v442_v17 }
 0x22f   : > { %1275 = vtanh.f32 %v505_v35 }
 0x235   : > { %v1276_v36 = vpop.eup %1275 }
 0x236   : > { %509 = vrot.lane.b32.xlu1 %v1276_v36, %s1427_s16 }
 0x2a8   : > { %v510_v38 = vpop.permute.xlu1 %509 }
 0x2a9   : > { %v512_v40 = vmul.f32 %v510_v38, %v507_v37 }
 0x2ab   : > { %v1602_v41 = vadd.f32 %v513_v39, %v512_v40 }
 0x2ad   : > { %v522_v42 = vpack.c.bf16 %v1602_v41, %v1602_v41 }
 0x2af   : > { %524 = vrot.lane.b32.xlu2 %v522_v42, %s1427_s16 }
 0x309   : > { %v525_v43 = vpop.permute.xlu2 %524 }
 0x30a   : > { %1177 = vmatmul.msk.bf16.vlgmr.msra.gmra.mxu1 %vm455_vm6, %v525_v43 }
 0x387   : > { %v538_v44 = vpop.f32.mrf.mxu1 }
 0x388   : > { %v562_v45 = vadd.f32 %v538_v44, %v1596_v13  ;;  %v542_v48 = vadd.f32 %v538_v44, %v521_v47 }
 0x38a   : > { %564 = vrot.lane.b32.xlu2 %v562_v45, %s1425_s10  ;;  %v1178_v49 = vmul.f32 -1.442695, %v542_v48  ;;  %v653_v45 = vld [vmem:[#allocation2 + $0x6] sm:$0x3] }
 0x38c   : > { %1277 = vpow2.f32 %v1178_v49 }
 0x38f   : > { %v540_v46 = vpop.f32.mrf.mxu1 }
 0x392   : > { %v1278_v50 = vpop.eup %1277 }
 0x393   : > { %v546_v51 = vadd.f32 1.0, %v1278_v50 }
 0x395   : > { %1279 = vrcp.f32 %v546_v51  ;;  %v558_v57 = vand.u32 2147483648, %v546_v51  ;;  %vm552_vm8 = vweird.f32 %v546_v51  ;;  %v556_v58 = vand.u32 2147483647, %v546_v51 }
 0x397   : > { %v559_v60 = vor.u32 1.1754944e-38, %v558_v57  ;;  %vm557_vm10 = vcmp.eq.f32.partialorder %v556_v58, 8.507059e+37 }
 0x39b   : > { %v1280_v52 = vpop.eup %1279 }
 0x39c   : > { %v548_v53 = vmul.f32 %v1280_v52, %v546_v51  ;;  %vm553_vm7 = vweird.f32 %v1280_v52 }
 0x39d   : > { %vm554_vm9 = vmor %vm552_vm8, %vm553_vm7 }
 0x39e   : > { %v549_v54 = vsub.f32 1.0, %v548_v53 }
 0x3a0   : > { %v550_v55 = vmul.f32 %v1280_v52, %v549_v54 }
 0x3a2   : > { %v551_v56 = vadd.f32 %v1280_v52, %v550_v55 }
 0x3a4   : > { %v555_v59 = vsel %vm554_vm9, %v1280_v52, %v551_v56 }
 0x3a5   : > { %v560_v62 = vsel %vm557_vm10, %v559_v60, %v555_v59 }
 0x3a6   : > { %v574_v3 = vsub.f32 1.0, %v560_v62  ;;  %v580_v5 = vmul.f32 %v560_v62, %v1602_v41 }
 0x3e4   : > { %v565_v61 = vpop.permute.xlu2 %564 }
 0x3e5   : > { %v567_v63 = vmul.f32 %v565_v61, %v560_v62 }
 0x3e7   : > { %569 = vrot.lane.b32.xlu0 %v567_v63, %s1425_s10 }
 0x459   : > { %v570_v0 = vpop.permute.xlu0 %569 }
 0x45a   : > { %v572_v1 = vadd.f32 %v570_v0, %v521_v47 }
 0x45c   : > { %1281 = vtanh.f32 %v572_v1 }
 0x462   : > { %v1282_v2 = vpop.eup %1281 }
 0x463   : > { %576 = vrot.lane.b32.xlu1 %v1282_v2, %s1427_s16 }
 0x4d5   : > { %v577_v4 = vpop.permute.xlu1 %576 }
 0x4d6   : > { %v579_v6 = vmul.f32 %v577_v4, %v574_v3 }
 0x4d8   : > { %v1613_v7 = vadd.f32 %v580_v5, %v579_v6 }
 0x4da   : > { %v588_v8 = vpack.c.bf16 %v1613_v7, %v1613_v7 }
 0x4dc   : > { %590 = vrot.lane.b32.xlu2 %v588_v8, %s1427_s16 }
 0x536   : > { %v591_v9 = vpop.permute.xlu2 %590 }
 0x537   : > { %1179 = vmatmul.msk.bf16.vlgmr.msra.gmra.mxu2 %vm455_vm6, %v591_v9 }
 0x5ba   : > { %v604_v10 = vpop.f32.mrf.mxu2 }
 0x5bb   : > { %v628_v11 = vadd.f32 %v604_v10, %v1596_v13  ;;  %v608_v15 = vadd.f32 %v604_v10, %v587_v14 }
 0x5bd   : > { %630 = vrot.lane.b32.xlu0 %v628_v11, %s1425_s10  ;;  %v1180_v16 = vmul.f32 -1.442695, %v608_v15 }
 0x5bf   : > { %1283 = vpow2.f32 %v1180_v16 }
 0x5c2   : > { %v606_v12 = vpop.f32.mrf.mxu2 }
 0x5c3   : > { %v719_v12 = vld [vmem:[#allocation2 + $0x8] sm:$0x3] }
 0x5c5   : > { %v1284_v17 = vpop.eup %1283 }
 0x5c6   : > { %v612_v18 = vadd.f32 1.0, %v1284_v17 }
 0x5c8   : > { %1285 = vrcp.f32 %v612_v18  ;;  %v624_v24 = vand.u32 2147483648, %v612_v18  ;;  %vm618_vm12 = vweird.f32 %v612_v18  ;;  %v622_v25 = vand.u32 2147483647, %v612_v18 }
 0x5ca   : > { %v625_v27 = vor.u32 1.1754944e-38, %v624_v24  ;;  %vm623_vm14 = vcmp.eq.f32.partialorder %v622_v25, 8.507059e+37 }
 0x5ce   : > { %v1286_v19 = vpop.eup %1285 }
 0x5cf   : > { %v614_v20 = vmul.f32 %v1286_v19, %v612_v18  ;;  %vm619_vm11 = vweird.f32 %v1286_v19 }
 0x5d0   : > { %vm620_vm13 = vmor %vm618_vm12, %vm619_vm11 }
 0x5d1   : > { %v615_v21 = vsub.f32 1.0, %v614_v20 }
 0x5d3   : > { %v616_v22 = vmul.f32 %v1286_v19, %v615_v21 }
 0x5d5   : > { %v617_v23 = vadd.f32 %v1286_v19, %v616_v22 }
 0x5d7   : > { %v621_v26 = vsel %vm620_vm13, %v1286_v19, %v617_v23 }
 0x5d8   : > { %v626_v29 = vsel %vm623_vm14, %v625_v27, %v621_v26 }
 0x5d9   : > { %v640_v34 = vsub.f32 1.0, %v626_v29  ;;  %v646_v36 = vmul.f32 %v626_v29, %v1613_v7 }
 0x62f   : > { %v631_v28 = vpop.permute.xlu0 %630 }
 0x630   : > { %v633_v30 = vmul.f32 %v631_v28, %v626_v29 }
 0x632   : > { %635 = vrot.lane.b32.xlu1 %v633_v30, %s1425_s10 }
 0x6a4   : > { %v636_v31 = vpop.permute.xlu1 %635 }
 0x6a5   : > { %v638_v32 = vadd.f32 %v636_v31, %v587_v14 }
 0x6a7   : > { %1287 = vtanh.f32 %v638_v32 }
 0x6ad   : > { %v1288_v33 = vpop.eup %1287 }
 0x6ae   : > { %642 = vrot.lane.b32.xlu2 %v1288_v33, %s1427_s16 }
 0x708   : > { %v643_v35 = vpop.permute.xlu2 %642 }
 0x709   : > { %v645_v37 = vmul.f32 %v643_v35, %v640_v34 }
 0x70b   : > { %v1624_v38 = vadd.f32 %v646_v36, %v645_v37 }
 0x70d   : > { %v654_v39 = vpack.c.bf16 %v1624_v38, %v1624_v38 }
 0x70f   : > { %656 = vrot.lane.b32.xlu0 %v654_v39, %s1427_s16 }
 0x781   : > { %v657_v40 = vpop.permute.xlu0 %656 }
 0x782   : > { %1181 = vmatmul.msk.bf16.vlgmr.msra.gmra.mxu3 %vm455_vm6, %v657_v40 }
 0x805   : > { %v670_v42 = vpop.f32.mrf.mxu3 }
 0x806   : > { %v694_v43 = vadd.f32 %v670_v42, %v1596_v13  ;;  %v674_v46 = vadd.f32 %v670_v42, %v653_v45 }
 0x808   : > { %696 = vrot.lane.b32.xlu1 %v694_v43, %s1425_s10  ;;  %v1182_v47 = vmul.f32 -1.442695, %v674_v46 }
 0x80a   : > { %1289 = vpow2.f32 %v1182_v47 }
 0x80d   : > { %v672_v44 = vpop.f32.mrf.mxu3 }
 0x810   : > { %v1290_v48 = vpop.eup %1289 }
 0x811   : > { %v678_v49 = vadd.f32 1.0, %v1290_v48 }
 0x813   : > { %1291 = vrcp.f32 %v678_v49  ;;  %v690_v55 = vand.u32 2147483648, %v678_v49  ;;  %vm684_vm0 = vweird.f32 %v678_v49  ;;  %v688_v56 = vand.u32 2147483647, %v678_v49 }
 0x815   : > { %v691_v58 = vor.u32 1.1754944e-38, %v690_v55  ;;  %vm689_vm2 = vcmp.eq.f32.partialorder %v688_v56, 8.507059e+37 }
 0x819   : > { %v1292_v50 = vpop.eup %1291 }
 0x81a   : > { %v680_v51 = vmul.f32 %v1292_v50, %v678_v49  ;;  %vm685_vm15 = vweird.f32 %v1292_v50 }
 0x81b   : > { %vm686_vm1 = vmor %vm684_vm0, %vm685_vm15 }
 0x81c   : > { %v681_v52 = vsub.f32 1.0, %v680_v51 }
 0x81e   : > { %v682_v53 = vmul.f32 %v1292_v50, %v681_v52 }
 0x820   : > { %v683_v54 = vadd.f32 %v1292_v50, %v682_v53 }
 0x822   : > { %v687_v57 = vsel %vm686_vm1, %v1292_v50, %v683_v54 }
 0x823   : > { %v692_v60 = vsel %vm689_vm2, %v691_v58, %v687_v57 }
 0x824   : > { %v706_v1 = vsub.f32 1.0, %v692_v60  ;;  %v712_v3 = vmul.f32 %v692_v60, %v1624_v38 }
 0x87a   : > { %v697_v59 = vpop.permute.xlu1 %696 }
 0x87b   : > { %v699_v61 = vmul.f32 %v697_v59, %v692_v60 }
 0x87d   : > { %701 = vrot.lane.b32.xlu2 %v699_v61, %s1425_s10 }
 0x8d7   : > { %v702_v62 = vpop.permute.xlu2 %701 }
 0x8d8   : > { %v704_v63 = vadd.f32 %v702_v62, %v653_v45  ;;  %v785_v45 = vld [vmem:[#allocation2 + $0xa] sm:$0x3] }
 0x8da   : > { %1293 = vtanh.f32 %v704_v63 }
 0x8e0   : > { %v1294_v0 = vpop.eup %1293 }
 0x8e1   : > { %708 = vrot.lane.b32.xlu0 %v1294_v0, %s1427_s16 }
 0x953   : > { %v709_v2 = vpop.permute.xlu0 %708 }
 0x954   : > { %v711_v4 = vmul.f32 %v709_v2, %v706_v1 }
 0x956   : > { %v1635_v5 = vadd.f32 %v712_v3, %v711_v4 }
 0x958   : > { %v720_v6 = vpack.c.bf16 %v1635_v5, %v1635_v5 }
 0x95a   : > { %722 = vrot.lane.b32.xlu1 %v720_v6, %s1427_s16 }
 0x9cc   : > { %v723_v8 = vpop.permute.xlu1 %722 }
 0x9cd   : > { %1183 = vmatmul.msk.bf16.vlgmr.msrb.gmra.mxu0 %vm455_vm6, %v723_v8 }
 0xa4a   : > { %v736_v9 = vpop.f32.mrf.mxu0 }
 0xa4b   : > { %v760_v10 = vadd.f32 %v736_v9, %v1596_v13  ;;  %v740_v14 = vadd.f32 %v736_v9, %v719_v12 }
 0xa4d   : > { %762 = vrot.lane.b32.xlu2 %v760_v10, %s1425_s10  ;;  %v1184_v15 = vmul.f32 -1.442695, %v740_v14  ;;  %v851_v14 = vld [vmem:[#allocation2 + $0xc] sm:$0x3] }
 0xa4f   : > { %1295 = vpow2.f32 %v1184_v15 }
 0xa52   : > { %v738_v11 = vpop.f32.mrf.mxu0 }
 0xa55   : > { %v1296_v16 = vpop.eup %1295 }
 0xa56   : > { %v744_v17 = vadd.f32 1.0, %v1296_v16 }
 0xa58   : > { %1297 = vrcp.f32 %v744_v17  ;;  %v756_v23 = vand.u32 2147483648, %v744_v17  ;;  %vm750_vm4 = vweird.f32 %v744_v17  ;;  %v754_v24 = vand.u32 2147483647, %v744_v17 }
 0xa5a   : > { %v757_v26 = vor.u32 1.1754944e-38, %v756_v23  ;;  %vm755_vm7 = vcmp.eq.f32.partialorder %v754_v24, 8.507059e+37 }
 0xa5e   : > { %v1298_v18 = vpop.eup %1297 }
 0xa5f   : > { %v746_v19 = vmul.f32 %v1298_v18, %v744_v17  ;;  %vm751_vm3 = vweird.f32 %v1298_v18 }
 0xa60   : > { %vm752_vm5 = vmor %vm750_vm4, %vm751_vm3  ;;  %vm519_vm4 = vcmask 254976  }
 0xa61   : > { %v747_v20 = vsub.f32 1.0, %v746_v19 }
 0xa63   : > { %v748_v21 = vmul.f32 %v1298_v18, %v747_v20 }
 0xa65   : > { %v749_v22 = vadd.f32 %v1298_v18, %v748_v21 }
 0xa67   : > { %v753_v25 = vsel %vm752_vm5, %v1298_v18, %v749_v22 }
 0xa68   : > { %v758_v28 = vsel %vm755_vm7, %v757_v26, %v753_v25 }
 0xa69   : > { %v772_v33 = vsub.f32 1.0, %v758_v28  ;;  %v778_v35 = vmul.f32 %v758_v28, %v1635_v5 }
 0xaa7   : > { %v763_v27 = vpop.permute.xlu2 %762 }
 0xaa8   : > { %v765_v29 = vmul.f32 %v763_v27, %v758_v28 }
 0xaaa   : > { %767 = vrot.lane.b32.xlu0 %v765_v29, %s1425_s10 }
 0xb1c   : > { %v768_v30 = vpop.permute.xlu0 %767 }
 0xb1d   : > { %v770_v31 = vadd.f32 %v768_v30, %v719_v12 }
 0xb1f   : > { %1299 = vtanh.f32 %v770_v31 }
 0xb25   : > { %v1300_v32 = vpop.eup %1299 }
 0xb26   : > { %774 = vrot.lane.b32.xlu1 %v1300_v32, %s1427_s16 }
 0xb98   : > { %v775_v34 = vpop.permute.xlu1 %774 }
 0xb99   : > { %v777_v36 = vmul.f32 %v775_v34, %v772_v33 }
 0xb9b   : > { %v1646_v37 = vadd.f32 %v778_v35, %v777_v36 }
 0xb9d   : > { %v786_v39 = vpack.c.bf16 %v1646_v37, %v1646_v37 }
 0xb9f   : > { %788 = vrot.lane.b32.xlu2 %v786_v39, %s1427_s16 }
 0xbf9   : > { %v789_v40 = vpop.permute.xlu2 %788 }
 0xbfa   : > { %1185 = vmatmul.msk.bf16.vlgmr.msrb.gmra.mxu1 %vm455_vm6, %v789_v40 }
 0xc77   : > { %v802_v42 = vpop.f32.mrf.mxu1 }
 0xc78   : > { %v826_v43 = vadd.f32 %v802_v42, %v1596_v13  ;;  %v806_v46 = vadd.f32 %v802_v42, %v785_v45 }
 0xc7a   : > { %828 = vrot.lane.b32.xlu0 %v826_v43, %s1425_s10  ;;  %v1186_v47 = vmul.f32 -1.442695, %v806_v46 }
 0xc7c   : > { %1301 = vpow2.f32 %v1186_v47  ;;  %v917_v47 = vld [vmem:[#allocation2 + $0xe] sm:$0x3] }
 0xc7f   : > { %v804_v44 = vpop.f32.mrf.mxu1 }
 0xc82   : > { %v1302_v48 = vpop.eup %1301 }
 0xc83   : > { %v810_v49 = vadd.f32 1.0, %v1302_v48 }
 0xc85   : > { %1303 = vrcp.f32 %v810_v49  ;;  %v822_v55 = vand.u32 2147483648, %v810_v49  ;;  %vm816_vm9 = vweird.f32 %v810_v49  ;;  %v820_v56 = vand.u32 2147483647, %v810_v49 }
 0xc87   : > { %v823_v58 = vor.u32 1.1754944e-38, %v822_v55  ;;  %vm821_vm11 = vcmp.eq.f32.partialorder %v820_v56, 8.507059e+37 }
 0xc8b   : > { %v1304_v50 = vpop.eup %1303 }
 0xc8c   : > { %v812_v51 = vmul.f32 %v1304_v50, %v810_v49  ;;  %vm817_vm8 = vweird.f32 %v1304_v50 }
 0xc8d   : > { %vm818_vm10 = vmor %vm816_vm9, %vm817_vm8 }
 0xc8e   : > { %v813_v52 = vsub.f32 1.0, %v812_v51 }
 0xc90   : > { %v814_v53 = vmul.f32 %v1304_v50, %v813_v52 }
 0xc92   : > { %v815_v54 = vadd.f32 %v1304_v50, %v814_v53 }
 0xc94   : > { %v819_v57 = vsel %vm818_vm10, %v1304_v50, %v815_v54 }
 0xc95   : > { %v824_v60 = vsel %vm821_vm11, %v823_v58, %v819_v57 }
 0xc96   : > { %v838_v1 = vsub.f32 1.0, %v824_v60  ;;  %v844_v3 = vmul.f32 %v824_v60, %v1646_v37 }
 0xcec   : > { %v829_v59 = vpop.permute.xlu0 %828 }
 0xced   : > { %v831_v61 = vmul.f32 %v829_v59, %v824_v60 }
 0xcef   : > { %833 = vrot.lane.b32.xlu1 %v831_v61, %s1425_s10 }
 0xd61   : > { %v834_v62 = vpop.permute.xlu1 %833 }
 0xd62   : > { %v836_v63 = vadd.f32 %v834_v62, %v785_v45 }
 0xd64   : > { %1305 = vtanh.f32 %v836_v63 }
 0xd6a   : > { %v1306_v0 = vpop.eup %1305 }
 0xd6b   : > { %840 = vrot.lane.b32.xlu2 %v1306_v0, %s1427_s16 }
 0xdc5   : > { %v841_v2 = vpop.permute.xlu2 %840 }
 0xdc6   : > { %v843_v4 = vmul.f32 %v841_v2, %v838_v1 }
 0xdc8   : > { %v1657_v6 = vadd.f32 %v844_v3, %v843_v4 }
 0xdca   : > { %v852_v8 = vpack.c.bf16 %v1657_v6, %v1657_v6 }
 0xdcc   : > { %854 = vrot.lane.b32.xlu0 %v852_v8, %s1427_s16 }
 0xe3e   : > { %v855_v9 = vpop.permute.xlu0 %854 }
 0xe3f   : > { %1187 = vmatmul.msk.bf16.vlgmr.msrb.gmra.mxu2 %vm455_vm6, %v855_v9 }
 0xec2   : > { %v868_v10 = vpop.f32.mrf.mxu2 }
 0xec3   : > { %v892_v11 = vadd.f32 %v868_v10, %v1596_v13  ;;  %v872_v15 = vadd.f32 %v868_v10, %v851_v14 }
 0xec5   : > { %894 = vrot.lane.b32.xlu1 %v892_v11, %s1425_s10  ;;  %v1188_v16 = vmul.f32 -1.442695, %v872_v15 }
 0xec7   : > { %1307 = vpow2.f32 %v1188_v16 }
 0xeca   : > { %v870_v12 = vpop.f32.mrf.mxu2 }
 0xecd   : > { %v1308_v17 = vpop.eup %1307 }
 0xece   : > { %v876_v18 = vadd.f32 1.0, %v1308_v17 }
 0xed0   : > { %1309 = vrcp.f32 %v876_v18  ;;  %v888_v24 = vand.u32 2147483648, %v876_v18  ;;  %vm882_vm13 = vweird.f32 %v876_v18  ;;  %v886_v25 = vand.u32 2147483647, %v876_v18 }
 0xed2   : > { %v889_v27 = vor.u32 1.1754944e-38, %v888_v24  ;;  %vm887_vm15 = vcmp.eq.f32.partialorder %v886_v25, 8.507059e+37 }
 0xed6   : > { %v1310_v19 = vpop.eup %1309 }
 0xed7   : > { %v878_v20 = vmul.f32 %v1310_v19, %v876_v18  ;;  %vm883_vm12 = vweird.f32 %v1310_v19 }
 0xed8   : > { %vm884_vm14 = vmor %vm882_vm13, %vm883_vm12 }
 0xed9   : > { %v879_v21 = vsub.f32 1.0, %v878_v20 }
 0xedb   : > { %v880_v22 = vmul.f32 %v1310_v19, %v879_v21 }
 0xedd   : > { %v881_v23 = vadd.f32 %v1310_v19, %v880_v22 }
 0xedf   : > { %v885_v26 = vsel %vm884_vm14, %v1310_v19, %v881_v23 }
 0xee0   : > { %v890_v29 = vsel %vm887_vm15, %v889_v27, %v885_v26 }
 0xee1   : > { %v904_v34 = vsub.f32 1.0, %v890_v29  ;;  %v910_v36 = vmul.f32 %v890_v29, %v1657_v6 }
 0xf37   : > { %v895_v28 = vpop.permute.xlu1 %894 }
 0xf38   : > { %v897_v30 = vmul.f32 %v895_v28, %v890_v29 }
 0xf3a   : > { %899 = vrot.lane.b32.xlu2 %v897_v30, %s1425_s10 }
 0xf94   : > { %v900_v31 = vpop.permute.xlu2 %899 }
 0xf95   : > { %v902_v32 = vadd.f32 %v900_v31, %v851_v14 }
 0xf97   : > { %1311 = vtanh.f32 %v902_v32 }
 0xf9d   : > { %v1312_v33 = vpop.eup %1311 }
 0xf9e   : > { %906 = vrot.lane.b32.xlu0 %v1312_v33, %s1427_s16 }
0x1010   : > { %v907_v35 = vpop.permute.xlu0 %906 }
0x1011   : > { %v909_v39 = vmul.f32 %v907_v35, %v904_v34 }
0x1013   : > { %v911_v40 = vadd.f32 %v910_v36, %v909_v39 }
0x1015   : > { %v918_v42 = vpack.c.bf16 %v911_v40, %v911_v40 }
0x1017   : > { %920 = vrot.lane.b32.xlu1 %v918_v42, %s1427_s16 }
0x1089   : > { %v921_v43 = vpop.permute.xlu1 %920 }
0x108a   : > { %1189 = vmatmul.msk.bf16.vlgmr.msrb.gmra.mxu3 %vm455_vm6, %v921_v43 }
0x110d   : > { %v934_v44 = vpop.f32.mrf.mxu3 }
0x110e   : > { %v958_v45 = vadd.f32 %v934_v44, %v1596_v13  ;;  %v938_v48 = vadd.f32 %v934_v44, %v917_v47 }
0x1110   : > { %960 = vrot.lane.b32.xlu2 %v958_v45, %s1425_s10  ;;  %v1190_v49 = vmul.f32 -1.442695, %v938_v48 }
0x1112   : > { %1313 = vpow2.f32 %v1190_v49 }
0x1115   : > { %v936_v46 = vpop.f32.mrf.mxu3 }
0x1118   : > { %516 = vrot.lane.b32.xlu2 %v1602_v41, %s1427_s16  ;;  %v1314_v50 = vpop.eup %1313 }
0x1119   : > { %v942_v51 = vadd.f32 1.0, %v1314_v50 }
0x111b   : > { %1315 = vrcp.f32 %v942_v51  ;;  %v954_v56 = vand.u32 2147483648, %v942_v51  ;;  %vm948_vm1 = vweird.f32 %v942_v51  ;;  %v952_v41 = vand.u32 2147483647, %v942_v51 }
0x111d   : > { %v955_v57 = vor.u32 1.1754944e-38, %v954_v56  ;;  %vm953_vm3 = vcmp.eq.f32.partialorder %v952_v41, 8.507059e+37 }
0x1120   : > { %715 = vrot.lane.b32.xlu2 %v1635_v5, %s1427_s16 }
0x1121   : > { %v1316_v52 = vpop.eup %1315 }
0x1122   : > { %v944_v13 = vmul.f32 %v1316_v52, %v942_v51  ;;  %vm949_vm0 = vweird.f32 %v1316_v52 }
0x1123   : > { %vm950_vm2 = vmor %vm948_vm1, %vm949_vm0 }
0x1124   : > { %v945_v53 = vsub.f32 1.0, %v944_v13 }
0x1126   : > { %v946_v54 = vmul.f32 %v1316_v52, %v945_v53 }
0x1128   : > { %913 = vrot.lane.b32.xlu2 %v911_v40, %s1427_s16  ;;  %v947_v55 = vadd.f32 %v1316_v52, %v946_v54 }
0x112a   : > { %v951_v5 = vsel %vm950_vm2, %v1316_v52, %v947_v55 }
0x112b   : > { %v956_v59 = vsel %vm953_vm3, %v955_v57, %v951_v5 }
0x112c   : > { %v976_v8 = vmul.f32 %v956_v59, %v911_v40 }
0x116a   : > { %v961_v58 = vpop.permute.xlu2 %960 }
0x116b   : > { %v963_v60 = vmul.f32 %v961_v58, %v956_v59 }
0x116d   : > { %965 = vrot.lane.b32.xlu0 %v963_v60, %s1425_s10 }
0x1172   : > { %v517_v61 = vpop.permute.xlu2 %516 }
0x1173   : > { %520 = vst.msk [vmem:[#allocation3] sm:$0x3] %vm519_vm4, %v517_v61 }
0x1175   : > { %583 = vrot.lane.b32.xlu0 %v1613_v7, %s1427_s16  ;;  %v970_v7 = vsub.f32 1.0, %v956_v59 }
0x117a   : > { %v716_v62 = vpop.permute.xlu2 %715 }
0x117b   : > { %718 = vst.msk [vmem:[#allocation3 + $0x6] sm:$0x3] %vm519_vm4, %v716_v62 }
0x117d   : > { %781 = vrot.lane.b32.xlu0 %v1646_v37, %s1427_s16 }
0x1182   : > { %v914_v63 = vpop.permute.xlu2 %913 }
0x1183   : > { %916 = vst.msk [vmem:[#allocation3 + $0xc] sm:$0x3] %vm519_vm4, %v914_v63 }
0x11df   : > { %v966_v0 = vpop.permute.xlu0 %965 }
0x11e0   : > { %v968_v1 = vadd.f32 %v966_v0, %v917_v47 }
0x11e2   : > { %1317 = vtanh.f32 %v968_v1 }
0x11e7   : > { %v584_v2 = vpop.permute.xlu0 %583 }
0x11e8   : > { %v1318_v3 = vpop.eup %1317  ;;  %586 = vst.msk [vmem:[#allocation3 + $0x2] sm:$0x3] %vm519_vm4, %v584_v2 }
0x11e9   : > { %972 = vrot.lane.b32.xlu1 %v1318_v3, %s1427_s16 }
0x11ef   : > { %v782_v4 = vpop.permute.xlu0 %781 }
0x11f0   : > { %784 = vst.msk [vmem:[#allocation3 + $0x8] sm:$0x3] %vm519_vm4, %v782_v4 }
0x11f1   : > { %649 = vrot.lane.b32.xlu1 %v1624_v38, %s1427_s16 }
0x11f9   : > { %847 = vrot.lane.b32.xlu1 %v1657_v6, %s1427_s16 }
0x125b   : > { %v973_v37 = vpop.permute.xlu1 %972 }
0x125c   : > { %v975_v9 = vmul.f32 %v973_v37, %v970_v7 }
0x125e   : > { %v977_v10 = vadd.f32 %v976_v8, %v975_v9 }
0x1260   : > { %979 = vrot.lane.b32.xlu0 %v977_v10, %s1427_s16 }
0x1263   : > { %v650_v11 = vpop.permute.xlu1 %649 }
0x1264   : > { %652 = vst.msk [vmem:[#allocation3 + $0x4] sm:$0x3] %vm519_vm4, %v650_v11 }
0x126b   : > { %v848_v12 = vpop.permute.xlu1 %847 }
0x126c   : > { %850 = vst.msk [vmem:[#allocation3 + $0xa] sm:$0x3] %vm519_vm4, %v848_v12 }
0x12d0   : > { %987 = sbr.rel (%p1191_p1) target bundleno = 4828 (0x12dc), region = 64 }
0x12d2   : > { %v980_v14 = vpop.permute.xlu0 %979 }
0x12d3   : > { %982 = vst.msk [vmem:[#allocation3 + $0xe] sm:$0x3] %vm519_vm4, %v980_v14 }
0x12d4   : > { %983 = vst.msk [vmem:[%s1582_s27] sm:$0x3] %vm519_vm4, %v980_v14 }
0x12d5   : > { %v988_v38 = vld [vmem:[#allocation3] sm:$0xff] }
0x12d6   : > { %990 = vst.msk [vmem:[%s1738_s7] sm:$0xff] %vm455_vm6, %v988_v38 }
0x12da   : > { %v989_v6 = vld [vmem:[#allocation3 + $0x8] sm:$0xff] }
0x12db   : > { %991 = vst.msk [vmem:[%s1738_s7 + $0x8] sm:$0xff] %vm455_vm6, %v989_v6 }
0x12dc PF: > { %p1192_p4 = scmp.ge.s32.totalorder %s1492_s9, 1 }
0x12de   : > { %995 = sbr.rel (%p1192_p4) target bundleno = 4980 (0x1374), region = 68 }
0x12e3   : > { %v1209_v15 = vld [vmem:[%s330_s18 + $0x8] sm:$0xff]  ;;  %v1208_v16 = vld [vmem:[%s330_s18] sm:$0xff]  ;;  %vm1036_vm5 = vcmask 785408  }
0x12e4   : > { %1028 = vmatpush.bf16.msra.mxu0 %v1209_v15  ;;  %v996_v17 = vld [vmem:[#allocation3] sm:$0xff]  ;;  %v997_v18 = vld [vmem:[#allocation3 + $0x8] sm:$0xff]  ;;  %v1319_v20 = vld [vmem:[%s384_s24] ss:$0 sm:$0xff] }
0x12e5   : > { %v998_v19 = vpack.c.bf16 %v997_v18, %v996_v17 }
0x12e8   : > { %1029 = vmatpush.bf16.msra.mxu0 %v1208_v16 }
0x12eb   : > { %1201 = vmatmul.msk.bf16.vlgmr.msra.gmra.mxu0 %vm455_vm6, %v998_v19 }
0x1368   : > { %v1031_v21 = vpop.f32.mrf.mxu0 }
0x1369   : > { %v1032_v22 = vadd.f32 %v1319_v20, %v1031_v21 }
0x136b   : > { %1037 = vst.msk [vmem:[#allocation2] sm:$0xff] %vm1036_vm5, %v1032_v22 }
0x1370   : > { %v1033_v23 = vpop.f32.mrf.mxu0 }
0x1371   : > { %v1034_v24 = vadd.f32 %v1319_v20, %v1033_v23 }
0x1373   : > { %1038 = vst.msk [vmem:[#allocation2 + $0x8] sm:$0xff] %vm1036_vm5, %v1034_v24 }
0x1374 PF: > { %p20_p5 = scmp.ge.s32.totalorder %s1517_s17, 4   ;;  %s1745_s27 = smov %s1410_s28 }
0x1375   : > { %s1746_s28 = smov %s1414_s29  ;;  %s1747_s29 = smov %s1527_s22 }
0x1376   : > { %s1748_s30 = smov %s1517_s17  ;;  %22 = sbr.rel (!%p20_p5) target bundleno = 6 (0x6), region = 122 }
0x137b   :  { %1064 = vsyncpa [#allocation5], 1 }
0x137c   :  { %1066 = vsyncpa [#allocation5 + $0x1], 1 }
0x137d   :  { %1067 = vsyncpa [#allocation7], 1 }
0x137e   :  { %1069 = vsyncpa [#allocation7 + $0x1], 1 }

</bundles_post_ra>
